<compile_context>
chip_gen: v6e
topology: v6e:2x2x1
jax: 0.10.0
libtpu: 0.0.40
codegen_flags: <defaults>
</compile_context>

<pallas_src>
import jax
import jax.numpy as jnp
from jax import lax
from jax.experimental import pallas as pl
from jax.experimental.pallas import tpu as pltpu

TM_MAX, TN_MAX, TK_MAX = 512, 512, 512   # bf16-friendly max tiles (review: raise to 512)
BN_ROW_TILE = 1024                       # row tile for the standalone BN+ReLU pass


def _round_up(x, m):
    return (x + m - 1) // m * m


def _use_bf16_vpu():
    """bf16 VALU exists on v6e/v7x; keep the f32 prologue path only for v5e and older."""
    try:
        kind = jax.devices()[0].device_kind.lower()
    except Exception:
        return True
    return not any(t in kind for t in ("v2", "v3", "v4", "v5"))


def _pick_tile(dim, max_tile, align):
    """Tile that avoids wrapper-side jnp.pad: full extent when small, else the largest
    divisor of `dim` that is a multiple of `align`; padding only as a rare fallback."""
    if dim <= max_tile:
        return dim, dim
    t = (max_tile // align) * align
    while t >= align:
        if dim % t == 0:
            return t, dim
        t -= align
    return max_tile, _round_up(dim, max_tile)


# ---------------------------------------------------------------------------
# Pallas kernels
# ---------------------------------------------------------------------------
def _make_matmul_kernel(has_pro, has_epi, multi_k, pro_bf16):
    """Tiled MXU matmul with optional fused BN+ReLU prologue (on A, per-K column) and/or
    fused BN+ReLU epilogue (on the output, per-N column).  When multi_k is False the
    accumulator scratch is skipped entirely (single K step writes o_ref directly)."""

    def kernel(*refs):
        idx = 0
        a_ref = refs[idx]; idx += 1
        b_ref = refs[idx]; idx += 1
        if has_pro:
            sa_ref = refs[idx]; idx += 1
            ba_ref = refs[idx]; idx += 1
        if has_epi:
            so_ref = refs[idx]; idx += 1
            bo_ref = refs[idx]; idx += 1
        o_ref = refs[idx]; idx += 1
        acc_ref = refs[idx] if multi_k else None

        a = a_ref[...]
        if has_pro:
            if pro_bf16:
                # bf16 VALU path (v6e/v7x): no f32 round-trip, half the VPU work.
                a = jnp.maximum(a * sa_ref[...] + ba_ref[...], 0.0).astype(jnp.bfloat16)
            else:
                # v5e and older: no bf16 VALU, do the affine+ReLU in f32.
                a32 = a.astype(jnp.float32)
                a = jnp.maximum(a32 * sa_ref[...] + ba_ref[...], 0.0).astype(jnp.bfloat16)

        partial = jnp.dot(a, b_ref[...], preferred_element_type=jnp.float32)

        if multi_k:
            k = pl.program_id(2)

            @pl.when(k == 0)
            def _():
                acc_ref[...] = jnp.zeros_like(acc_ref)

            acc_ref[...] += partial

            @pl.when(k == pl.num_programs(2) - 1)
            def _():
                r = acc_ref[...]
                if has_epi:
                    r = jnp.maximum(r * so_ref[...] + bo_ref[...], 0.0)
                o_ref[...] = r.astype(o_ref.dtype)
        else:
            r = partial
            if has_epi:
                r = jnp.maximum(r * so_ref[...] + bo_ref[...], 0.0)
            o_ref[...] = r.astype(o_ref.dtype)

    return kernel


def fused_matmul(a, b, pro=None, epi=None, out_dtype=jnp.bfloat16):
    """a: (M, K), b: (K, N).  bf16 operands, f32 accumulation on the MXU.
    pro = (scale, shift) of shape (1, K): relu(a*scale+shift) applied to A.
    epi = (scale, shift) of shape (1, N): relu(out*scale+shift) applied to the result."""
    M, K = a.shape
    K2, N = b.shape
    assert K == K2
    a = a.astype(jnp.bfloat16)
    b = b.astype(jnp.bfloat16)

    tm, Mp = _pick_tile(M, TM_MAX, 8)
    tn, Np = _pick_tile(N, TN_MAX, 128)
    tk, Kp = _pick_tile(K, TK_MAX, 128)

    # v7x has 2 TensorCores: give the "parallel" grid >= 2 blocks when there is enough
    # work (one harmless extra grid step, ~0.35us, on 1-TC chips).
    if (Mp // tm) * (Np // tn) == 1 and M >= 256 and M % 16 == 0:
        tm = M // 2

    if Mp != M or Kp != K:
        a = jnp.pad(a, ((0, Mp - M), (0, Kp - K)))
    if Kp != K or Np != N:
        b = jnp.pad(b, ((0, Kp - K), (0, Np - N)))

    multi_k = (Kp // tk) > 1
    if multi_k:
        grid = (Mp // tm, Np // tn, Kp // tk)
        dims = ("parallel", "parallel", "arbitrary")
        a_spec = pl.BlockSpec((tm, tk), lambda i, j, k: (i, k))
        b_spec = pl.BlockSpec((tk, tn), lambda i, j, k: (k, j))
        o_spec = pl.BlockSpec((tm, tn), lambda i, j, k: (i, j))
        kvec = lambda i, j, k: (0, k)
        nvec = lambda i, j, k: (0, j)
        scratch = [pltpu.VMEM((tm, tn), jnp.float32)]
    else:
        grid = (Mp // tm, Np // tn)
        dims = ("parallel", "parallel")
        a_spec = pl.BlockSpec((tm, tk), lambda i, j: (i, 0))
        b_spec = pl.BlockSpec((tk, tn), lambda i, j: (0, j))
        o_spec = pl.BlockSpec((tm, tn), lambda i, j: (i, j))
        kvec = lambda i, j: (0, 0)
        nvec = lambda i, j: (0, j)
        scratch = []

    inputs = [a, b]
    in_specs = [a_spec, b_spec]
    pro_bf16 = False
    if pro is not None:
        sa, ba = pro
        pro_bf16 = (sa.dtype == jnp.bfloat16)
        if Kp != K:
            sa = jnp.pad(sa, ((0, 0), (0, Kp - K)))
            ba = jnp.pad(ba, ((0, 0), (0, Kp - K)))
        inputs += [sa, ba]
        in_specs += [pl.BlockSpec((1, tk), kvec), pl.BlockSpec((1, tk), kvec)]
    if epi is not None:
        so, bo = epi
        if Np != N:
            so = jnp.pad(so, ((0, 0), (0, Np - N)))
            bo = jnp.pad(bo, ((0, 0), (0, Np - N)))
        inputs += [so, bo]
        in_specs += [pl.BlockSpec((1, tn), nvec), pl.BlockSpec((1, tn), nvec)]

    kernel = _make_matmul_kernel(pro is not None, epi is not None, multi_k, pro_bf16)
    out = pl.pallas_call(
        kernel,
        out_shape=jax.ShapeDtypeStruct((Mp, Np), out_dtype),
        grid_spec=pltpu.PrefetchScalarGridSpec(
            num_scalar_prefetch=0,
            grid=grid,
            in_specs=in_specs,
            out_specs=o_spec,
            scratch_shapes=scratch),
        compiler_params=pltpu.CompilerParams(dimension_semantics=dims),
    )(*inputs)
    if Mp != M or Np != N:
        out = out[:M, :N]
    return out


def _bn_relu_kernel(x_ref, s_ref, b_ref, o_ref):
    x = x_ref[...].astype(jnp.float32)
    o_ref[...] = jnp.maximum(x * s_ref[...] + b_ref[...], 0.0).astype(o_ref.dtype)


def pallas_bn_relu(x2d, scale2d, shift2d, out_dtype=jnp.bfloat16):
    """Standalone fused BN(eval)+ReLU (stem norm0+relu0 and norm5 + trailing F.relu).
    bf16 output halves VMEM + HBM writeback (fits v5e's 16 MiB scoped VMEM at scale)."""
    M, C = x2d.shape
    if M <= BN_ROW_TILE:
        tm, Mp = M, M
    else:
        tm, Mp = BN_ROW_TILE, _round_up(M, BN_ROW_TILE)
    xp = x2d if Mp == M else jnp.pad(x2d, ((0, Mp - M), (0, 0)))
    out = pl.pallas_call(
        _bn_relu_kernel,
        out_shape=jax.ShapeDtypeStruct((Mp, C), out_dtype),
        grid_spec=pltpu.PrefetchScalarGridSpec(
            num_scalar_prefetch=0,
            grid=(Mp // tm,),
            in_specs=[pl.BlockSpec((tm, C), lambda i: (i, 0)),
                      pl.BlockSpec((1, C), lambda i: (0, 0)),
                      pl.BlockSpec((1, C), lambda i: (0, 0))],
            out_specs=pl.BlockSpec((tm, C), lambda i: (i, 0))),
        compiler_params=pltpu.CompilerParams(dimension_semantics=("parallel",)),
    )(xp, scale2d, shift2d)
    return out if Mp == M else out[:M]


def _classifier_kernel(x_ref, w_ref, b_ref, o_ref):
    y = jnp.dot(x_ref[...], w_ref[...], preferred_element_type=jnp.float32) + b_ref[...]
    o_ref[...] = jax.nn.sigmoid(y)


def pallas_classifier(x, w, b2d):
    """Fused Linear + bias + sigmoid, bf16 operands, full-extent blocks (no row padding)."""
    B, C = x.shape
    O = w.shape[1]
    return pl.pallas_call(
        _classifier_kernel,
        out_shape=jax.ShapeDtypeStruct((B, O), jnp.float32),
        grid_spec=pltpu.PrefetchScalarGridSpec(
            num_scalar_prefetch=0,
            grid=(1,),
            in_specs=[pl.BlockSpec((B, C), lambda i: (0, 0)),
                      pl.BlockSpec((C, O), lambda i: (0, 0)),
                      pl.BlockSpec((1, O), lambda i: (0, 0))],
            out_specs=pl.BlockSpec((B, O), lambda i: (0, 0))),
    )(x.astype(jnp.bfloat16), w.astype(jnp.bfloat16), b2d)


# ---------------------------------------------------------------------------
# Layer helpers (NHWC)
# ---------------------------------------------------------------------------
def _fold_taps_3x3(y):
    """y: (N, H, W, 9, C) per-tap partial conv outputs computed at the tap's INPUT pixel
    (tap-major matmul).  Conv2d(k=3, pad=1, stride=1) output = sum of 9 spatially
    shifted taps with zero padding."""
    N, H, W, T, C = y.shape
    yp = jnp.pad(y, ((0, 0), (1, 1), (1, 1), (0, 0), (0, 0)))
    out = jnp.zeros((N, H, W, C), jnp.float32)
    for di in range(3):
        for dj in range(3):
            out = out + yp[:, di:di + H, dj:dj + W, di * 3 + dj, :].astype(jnp.float32)
    return out.astype(jnp.bfloat16)


def maxpool_3x3_s2_p1(x):
    init = jnp.asarray(-jnp.inf, dtype=x.dtype)
    return lax.reduce_window(x, init, lax.max,
                             window_dimensions=(1, 3, 3, 1),
                             window_strides=(1, 2, 2, 1),
                             padding=((0, 0), (1, 1), (1, 1), (0, 0)))


def avgpool_2x2(x):
    # Matches F.avg_pool2d(kernel=2, stride=2): floors odd spatial dims.
    N, H, W, C = x.shape
    Hc, Wc = (H // 2) * 2, (W // 2) * 2
    xc = x[:, :Hc, :Wc, :].astype(jnp.float32)
    return xc.reshape(N, Hc // 2, 2, Wc // 2, 2, C).mean(axis=(2, 4)).astype(x.dtype)


# ---------------------------------------------------------------------------
# Parameter construction (deterministic) + one-time kernel-layout prep
# ---------------------------------------------------------------------------
def init_densenet_params(key, growth_rate, block_config, num_init_features,
                         bn_size, in_channels, out_channels):
    keys = iter(jax.random.split(key, 4096))

    def conv_w(cout, cin, kh, kw):
        fan_in = cin * kh * kw
        return jax.random.normal(next(keys), (cout, cin, kh, kw),
                                 jnp.float32) / jnp.sqrt(float(fan_in))

    def bn_p(c):
        k1, k2, k3 = jax.random.split(next(keys), 3)
        return dict(gamma=1.0 + 0.1 * jax.random.normal(k1, (c,), jnp.float32),
                    beta=0.1 * jax.random.normal(k2, (c,), jnp.float32),
                    mean=0.1 * jax.random.normal(k3, (c,), jnp.float32),
                    var=jnp.ones((c,), jnp.float32))

    params = {'conv0': conv_w(num_init_features, in_channels, 7, 7),
              'norm0': bn_p(num_init_features),
              'blocks': [], 'transitions': []}
    num_features = num_init_features
    for bi, num_layers in enumerate(block_config):
        layers = []
        for i in range(num_layers):
            nin = num_features + i * growth_rate
            layers.append(dict(
                norm1=bn_p(nin),
                conv1=conv_w(bn_size * growth_rate, nin, 1, 1),
                norm2=bn_p(bn_size * growth_rate),
                conv2=conv_w(growth_rate, bn_size * growth_rate, 3, 3)))
        params['blocks'].append(layers)
        num_features = num_features + num_layers * growth_rate
        if bi != len(block_config) - 1:
            params['transitions'].append(dict(
                norm=bn_p(num_features),
                conv=conv_w(num_features // 2, num_features, 1, 1)))
            num_features = num_features // 2
    params['norm5'] = bn_p(num_features)
    params['cls_w'] = jax.random.normal(next(keys), (out_channels, num_features),
                                        jnp.float32) / jnp.sqrt(float(num_features))
    params['cls_b'] = 0.01 * jax.random.normal(next(keys), (out_channels,), jnp.float32)
    return params


def prepare_params(params, use_bf16_vpu=None):
    """One-time hoist: conv weights -> matmul layouts (bf16), BN -> (scale, shift).
    Prologue BN scales are pre-cast to bf16 on chips with a bf16 VPU (v6e/v7x)."""
    if use_bf16_vpu is None:
        use_bf16_vpu = _use_bf16_vpu()
    pro_dt = jnp.bfloat16 if use_bf16_vpu else jnp.float32

    def bn_ss(bn, dtype=jnp.float32):
        scale = bn['gamma'] / jnp.sqrt(bn['var'] + 1e-5)
        shift = bn['beta'] - bn['mean'] * scale
        return (scale.reshape(1, -1).astype(dtype), shift.reshape(1, -1).astype(dtype))

    def conv1x1_mat(w):                       # (cout, cin, 1, 1) -> (cin, cout)
        cout, cin = w.shape[:2]
        return w.reshape(cout, cin).T.astype(jnp.bfloat16)

    def conv_tapmajor_mat(w):                 # (cout, cin, kh, kw) -> (cin, kh*kw*cout)
        cout, cin, kh, kw = w.shape
        return (jnp.transpose(w, (1, 2, 3, 0))
                .reshape(cin, kh * kw * cout).astype(jnp.bfloat16))

    prep = {'conv0_w': jnp.transpose(params['conv0'], (2, 3, 1, 0)).astype(jnp.bfloat16),
            'norm0': bn_ss(params['norm0'], jnp.float32),
            'blocks': [], 'transitions': [],
            'norm5': bn_ss(params['norm5'], jnp.float32),
            'cls_w': params['cls_w'].T.astype(jnp.bfloat16),
            'cls_b': params['cls_b'].reshape(1, -1).astype(jnp.float32)}
    for layers in params['blocks']:
        prep['blocks'].append([
            dict(norm1=bn_ss(l['norm1'], pro_dt),        # prologue (on bf16 A tile)
                 conv1_w=conv1x1_mat(l['conv1']),
                 norm2=bn_ss(l['norm2'], jnp.float32),   # epilogue (on f32 accumulator)
                 conv2_w=conv_tapmajor_mat(l['conv2']))
            for l in layers])
    for t in params['transitions']:
        prep['transitions'].append(dict(norm=bn_ss(t['norm'], pro_dt),
                                        conv_w=conv1x1_mat(t['conv'])))
    return prep


# ---------------------------------------------------------------------------
# Forward pass
# ---------------------------------------------------------------------------
def densenet_forward(prep, x_nchw):
    x = jnp.transpose(x_nchw, (0, 2, 3, 1)).astype(jnp.bfloat16)   # NCHW -> NHWC

    # --- stem: conv0 (7x7/s2) via XLA's native conv (per perf review: the 49-tap im2col
    #     inflates A-operand HBM traffic ~12x and K=49*Cin is not lane-aligned), then
    #     fused Pallas BN+ReLU (norm0+relu0), then pool0.
    # TODO(synk): stem conv stays on lax.conv_general_dilated by design.
    x = lax.conv_general_dilated(x, prep['conv0_w'], (2, 2), ((3, 3), (3, 3)),
                                 dimension_numbers=('NHWC', 'HWIO', 'NHWC'),
                                 preferred_element_type=jnp.float32)
    N, H, W, C = x.shape
    x = pallas_bn_relu(x.reshape(N * H * W, C), prep['norm0'][0], prep['norm0'][1],
                       out_dtype=jnp.bfloat16).reshape(N, H, W, C)
    x = maxpool_3x3_s2_p1(x)

    # --- dense blocks + transitions (preallocated channel slab replaces O(L^2) concat)
    for bi, layers in enumerate(prep['blocks']):
        N, H, W, C0 = x.shape
        M = N * H * W
        growth = layers[0]['conv2_w'].shape[1] // 9
        C_total = C0 + len(layers) * growth
        slab = jnp.pad(x, ((0, 0), (0, 0), (0, 0), (0, C_total - C0)))
        for i, layer in enumerate(layers):
            cin = C0 + i * growth
            a = slab[..., :cin].reshape(M, cin)
            # conv1 (1x1): norm1+relu1 fused prologue, norm2+relu2 fused epilogue
            b = fused_matmul(a, layer['conv1_w'],
                             pro=layer['norm1'], epi=layer['norm2'])
            # conv2 (3x3, pad 1) TAP-MAJOR: (M,Cmid)@(Cmid,9*growth) lane-dense matmul,
            # then 9 spatially shifted adds fold the taps (zero padding is exact since
            # the input is already post-BN/ReLU).  drop_rate == 0 -> no dropout.
            y = fused_matmul(b, layer['conv2_w'])
            y = _fold_taps_3x3(y.reshape(N, H, W, 9, growth))
            slab = lax.dynamic_update_slice(slab, y, (0, 0, 0, cin))
        x = slab
        if bi != len(prep['blocks']) - 1:
            t = prep['transitions'][bi]
            Cc = x.shape[-1]
            # transition: norm+relu fused as prologue of the 1x1 conv, then avgpool
            y = fused_matmul(x.reshape(M, Cc), t['conv_w'], pro=t['norm'])
            x = avgpool_2x2(y.reshape(N, H, W, -1))

    # --- norm5 + F.relu (fused Pallas kernel, bf16 out), global avg pool, classifier
    N, H, W, C = x.shape
    x = pallas_bn_relu(x.reshape(N * H * W, C), prep['norm5'][0], prep['norm5'][1],
                       out_dtype=jnp.bfloat16)
    x = x.reshape(N, H * W, C).astype(jnp.float32).mean(axis=1).astype(jnp.bfloat16)
    return pallas_classifier(x, prep['cls_w'], prep['cls_b'])


# ---------------------------------------------------------------------------
if __name__ == "__main__":
    # Small DenseNet config (constructor-consistent), small input.
    growth_rate = 8
    block_config = (2, 2)
    num_init_features = 16
    bn_size = 2
    in_channels = 1
    out_channels = 2

    root = jax.random.PRNGKey(0)
    k_x, k_p = jax.random.split(root)
    x = jax.random.normal(k_x, (2, in_channels, 32, 32), jnp.float32)  # NCHW like PyTorch

    params = init_densenet_params(k_p, growth_rate, block_config, num_init_features,
                                  bn_size, in_channels, out_channels)
    prep = prepare_params(params)        # one-time weight/BN layout prep (hoisted)

    fwd = jax.jit(densenet_forward)
    out = jax.block_until_ready(fwd(prep, x))
    assert out.shape == (2, out_channels)
    assert bool(jnp.all(jnp.isfinite(out)))
    print("KERNEL_OK")
</pallas_src>

<mosaic_0001>
module attributes {stable_mosaic.version = 11 : i64} {
  func.func @_bn_relu_kernel(%arg0: i32, %arg1: memref<512x16xf32, #tpu.memory_space<vmem>>, %arg2: memref<1x16xf32, #tpu.memory_space<vmem>>, %arg3: memref<1x16xf32, #tpu.memory_space<vmem>>, %arg4: memref<512x16xbf16, #tpu.memory_space<vmem>>) attributes {dimension_semantics = [#tpu.dimension_semantics<parallel>], iteration_bounds = array<i64: 1>, scalar_prefetch = 0 : i64, scratch_operands = 0 : i64, tpu.core_type = #tpu.core_type<tc>, window_params = [{transform_indices = @transform_0, window_bounds = array<i64: 512, 16>}, {pipeline_mode = #tpu.pipeline_mode<synchronous>, transform_indices = @transform_1, window_bounds = array<i64: 1, 16>}, {pipeline_mode = #tpu.pipeline_mode<synchronous>, transform_indices = @transform_2, window_bounds = array<i64: 1, 16>}, {transform_indices = @transform_3, window_bounds = array<i64: 512, 16>}]} {
    %c0 = arith.constant 0 : index
    %c0_0 = arith.constant 0 : index
    %0 = vector.load %arg1[%c0, %c0_0] : memref<512x16xf32, #tpu.memory_space<vmem>>, vector<512x16xf32>
    %c0_1 = arith.constant 0 : index
    %c0_2 = arith.constant 0 : index
    %1 = vector.load %arg2[%c0_1, %c0_2] : memref<1x16xf32, #tpu.memory_space<vmem>>, vector<1x16xf32>
    %2 = vector.broadcast %1 : vector<1x16xf32> to vector<512x16xf32>
    %3 = arith.mulf %0, %2 : vector<512x16xf32>
    %c0_3 = arith.constant 0 : index
    %c0_4 = arith.constant 0 : index
    %4 = vector.load %arg3[%c0_3, %c0_4] : memref<1x16xf32, #tpu.memory_space<vmem>>, vector<1x16xf32>
    %5 = vector.broadcast %4 : vector<1x16xf32> to vector<512x16xf32>
    %6 = arith.addf %3, %5 : vector<512x16xf32>
    %cst = arith.constant 0.000000e+00 : f32
    %7 = vector.broadcast %cst : f32 to vector<512x16xf32>
    %8 = arith.maximumf %6, %7 : vector<512x16xf32>
    %9 = arith.truncf %8 : vector<512x16xf32> to vector<512x16xbf16>
    %c0_5 = arith.constant 0 : index
    %c0_6 = arith.constant 0 : index
    %10 = vector.load %arg4[%c0_5, %c0_6] : memref<512x16xbf16, #tpu.memory_space<vmem>>, vector<512x16xbf16>
    tpu.vector_store %arg4[%c0_5, %c0_6], %9 {strides = array<i32>} : memref<512x16xbf16, #tpu.memory_space<vmem>>, vector<512x16xbf16>,
    return
  }
  func.func @transform_0(%arg0: i32) -> (i32, i32) {
    %c0_i32 = arith.constant 0 : i32
    %c0_i32_0 = arith.constant 0 : i32
    return %arg0, %c0_i32 : i32, i32
  }
  func.func @transform_1(%arg0: i32) -> (i32, i32) {
    %c0_i32 = arith.constant 0 : i32
    %c0_i32_0 = arith.constant 0 : i32
    %c0_i32_1 = arith.constant 0 : i32
    return %c0_i32, %c0_i32_0 : i32, i32
  }
  func.func @transform_2(%arg0: i32) -> (i32, i32) {
    %c0_i32 = arith.constant 0 : i32
    %c0_i32_0 = arith.constant 0 : i32
    %c0_i32_1 = arith.constant 0 : i32
    return %c0_i32, %c0_i32_0 : i32, i32
  }
  func.func @transform_3(%arg0: i32) -> (i32, i32) {
    %c0_i32 = arith.constant 0 : i32
    %c0_i32_0 = arith.constant 0 : i32
    return %arg0, %c0_i32 : i32, i32
  }
}

module attributes {stable_mosaic.version = 11 : i64} {
  func.func @kernel(%arg0: i32, %arg1: i32, %arg2: memref<128x16xbf16, #tpu.memory_space<vmem>>, %arg3: memref<16x16xbf16, #tpu.memory_space<vmem>>, %arg4: memref<1x16xbf16, #tpu.memory_space<vmem>>, %arg5: memref<1x16xbf16, #tpu.memory_space<vmem>>, %arg6: memref<1x16xf32, #tpu.memory_space<vmem>>, %arg7: memref<1x16xf32, #tpu.memory_space<vmem>>, %arg8: memref<128x16xbf16, #tpu.memory_space<vmem>>) attributes {dimension_semantics = [#tpu.dimension_semantics<parallel>, #tpu.dimension_semantics<parallel>], iteration_bounds = array<i64: 1, 1>, scalar_prefetch = 0 : i64, scratch_operands = 0 : i64, tpu.core_type = #tpu.core_type<tc>, window_params = [{transform_indices = @transform_0, window_bounds = array<i64: 128, 16>}, {transform_indices = @transform_1, window_bounds = array<i64: 16, 16>}, {pipeline_mode = #tpu.pipeline_mode<synchronous>, transform_indices = @transform_2, window_bounds = array<i64: 1, 16>}, {pipeline_mode = #tpu.pipeline_mode<synchronous>, transform_indices = @transform_3, window_bounds = array<i64: 1, 16>}, {transform_indices = @transform_4, window_bounds = array<i64: 1, 16>}, {transform_indices = @transform_5, window_bounds = array<i64: 1, 16>}, {transform_indices = @transform_6, window_bounds = array<i64: 128, 16>}]} {
    %c0 = arith.constant 0 : index
    %c0_0 = arith.constant 0 : index
    %0 = vector.load %arg2[%c0, %c0_0] : memref<128x16xbf16, #tpu.memory_space<vmem>>, vector<128x16xbf16>
    %c0_1 = arith.constant 0 : index
    %c0_2 = arith.constant 0 : index
    %1 = vector.load %arg4[%c0_1, %c0_2] : memref<1x16xbf16, #tpu.memory_space<vmem>>, vector<1x16xbf16>
    %2 = vector.broadcast %1 : vector<1x16xbf16> to vector<128x16xbf16>
    %3 = arith.mulf %0, %2 : vector<128x16xbf16>
    %c0_3 = arith.constant 0 : index
    %c0_4 = arith.constant 0 : index
    %4 = vector.load %arg5[%c0_3, %c0_4] : memref<1x16xbf16, #tpu.memory_space<vmem>>, vector<1x16xbf16>
    %5 = vector.broadcast %4 : vector<1x16xbf16> to vector<128x16xbf16>
    %6 = arith.addf %3, %5 : vector<128x16xbf16>
    %cst = arith.constant 0.000000e+00 : bf16
    %7 = vector.broadcast %cst : bf16 to vector<128x16xbf16>
    %8 = arith.maximumf %6, %7 : vector<128x16xbf16>
    %c0_5 = arith.constant 0 : index
    %c0_6 = arith.constant 0 : index
    %9 = vector.load %arg3[%c0_5, %c0_6] : memref<16x16xbf16, #tpu.memory_space<vmem>>, vector<16x16xbf16>
    %cst_7 = arith.constant dense<0.000000e+00> : vector<128x16xf32>
    %10 = tpu.matmul %8, %9, %cst_7 {dimension_numbers = #tpu.dot_dimension_numbers<[1], [0], [0], [1], [0, 0, 1, 1], [], []>} : vector<128x16xbf16>, vector<16x16xbf16>, vector<128x16xf32> -> vector<128x16xf32>
    %c0_8 = arith.constant 0 : index
    %c0_9 = arith.constant 0 : index
    %11 = vector.load %arg6[%c0_8, %c0_9] : memref<1x16xf32, #tpu.memory_space<vmem>>, vector<1x16xf32>
    %12 = vector.broadcast %11 : vector<1x16xf32> to vector<128x16xf32>
    %13 = arith.mulf %10, %12 : vector<128x16xf32>
    %c0_10 = arith.constant 0 : index
    %c0_11 = arith.constant 0 : index
    %14 = vector.load %arg7[%c0_10, %c0_11] : memref<1x16xf32, #tpu.memory_space<vmem>>, vector<1x16xf32>
    %15 = vector.broadcast %14 : vector<1x16xf32> to vector<128x16xf32>
    %16 = arith.addf %13, %15 : vector<128x16xf32>
    %cst_12 = arith.constant 0.000000e+00 : f32
    %17 = vector.broadcast %cst_12 : f32 to vector<128x16xf32>
    %18 = arith.maximumf %16, %17 : vector<128x16xf32>
    %19 = arith.truncf %18 : vector<128x16xf32> to vector<128x16xbf16>
    %c0_13 = arith.constant 0 : index
    %c0_14 = arith.constant 0 : index
    %20 = vector.load %arg8[%c0_13, %c0_14] : memref<128x16xbf16, #tpu.memory_space<vmem>>, vector<128x16xbf16>
    tpu.vector_store %arg8[%c0_13, %c0_14], %19 {strides = array<i32>} : memref<128x16xbf16, #tpu.memory_space<vmem>>, vector<128x16xbf16>,
    return
  }
  func.func @transform_0(%arg0: i32, %arg1: i32) -> (i32, i32) {
    %c0_i32 = arith.constant 0 : i32
    %c0_i32_0 = arith.constant 0 : i32
    return %arg0, %c0_i32 : i32, i32
  }
  func.func @transform_1(%arg0: i32, %arg1: i32) -> (i32, i32) {
    %c0_i32 = arith.constant 0 : i32
    %c0_i32_0 = arith.constant 0 : i32
    return %c0_i32, %arg1 : i32, i32
  }
  func.func @transform_2(%arg0: i32, %arg1: i32) -> (i32, i32) {
    %c0_i32 = arith.constant 0 : i32
    %c0_i32_0 = arith.constant 0 : i32
    %c0_i32_1 = arith.constant 0 : i32
    return %c0_i32, %c0_i32_0 : i32, i32
  }
  func.func @transform_3(%arg0: i32, %arg1: i32) -> (i32, i32) {
    %c0_i32 = arith.constant 0 : i32
    %c0_i32_0 = arith.constant 0 : i32
    %c0_i32_1 = arith.constant 0 : i32
    return %c0_i32, %c0_i32_0 : i32, i32
  }
  func.func @transform_4(%arg0: i32, %arg1: i32) -> (i32, i32) {
    %c0_i32 = arith.constant 0 : i32
    %c0_i32_0 = arith.constant 0 : i32
    return %c0_i32, %arg1 : i32, i32
  }
  func.func @transform_5(%arg0: i32, %arg1: i32) -> (i32, i32) {
    %c0_i32 = arith.constant 0 : i32
    %c0_i32_0 = arith.constant 0 : i32
    return %c0_i32, %arg1 : i32, i32
  }
  func.func @transform_6(%arg0: i32, %arg1: i32) -> (i32, i32) {
    %c0_i32 = arith.constant 0 : i32
    return %arg0, %arg1 : i32, i32
  }
}

module attributes {stable_mosaic.version = 11 : i64} {
  func.func @kernel(%arg0: i32, %arg1: i32, %arg2: memref<128x16xbf16, #tpu.memory_space<vmem>>, %arg3: memref<16x72xbf16, #tpu.memory_space<vmem>>, %arg4: memref<128x72xbf16, #tpu.memory_space<vmem>>) attributes {dimension_semantics = [#tpu.dimension_semantics<parallel>, #tpu.dimension_semantics<parallel>], iteration_bounds = array<i64: 1, 1>, scalar_prefetch = 0 : i64, scratch_operands = 0 : i64, tpu.core_type = #tpu.core_type<tc>, window_params = [{transform_indices = @transform_0, window_bounds = array<i64: 128, 16>}, {transform_indices = @transform_1, window_bounds = array<i64: 16, 72>}, {transform_indices = @transform_2, window_bounds = array<i64: 128, 72>}]} {
    %c0 = arith.constant 0 : index
    %c0_0 = arith.constant 0 : index
    %0 = vector.load %arg2[%c0, %c0_0] : memref<128x16xbf16, #tpu.memory_space<vmem>>, vector<128x16xbf16>
    %c0_1 = arith.constant 0 : index
    %c0_2 = arith.constant 0 : index
    %1 = vector.load %arg3[%c0_1, %c0_2] : memref<16x72xbf16, #tpu.memory_space<vmem>>, vector<16x72xbf16>
    %cst = arith.constant dense<0.000000e+00> : vector<128x72xf32>
    %2 = tpu.matmul %0, %1, %cst {dimension_numbers = #tpu.dot_dimension_numbers<[1], [0], [0], [1], [0, 0, 1, 1], [], []>} : vector<128x16xbf16>, vector<16x72xbf16>, vector<128x72xf32> -> vector<128x72xf32>
    %3 = arith.truncf %2 : vector<128x72xf32> to vector<128x72xbf16>
    %c0_3 = arith.constant 0 : index
    %c0_4 = arith.constant 0 : index
    %4 = vector.load %arg4[%c0_3, %c0_4] : memref<128x72xbf16, #tpu.memory_space<vmem>>, vector<128x72xbf16>
    tpu.vector_store %arg4[%c0_3, %c0_4], %3 {strides = array<i32>} : memref<128x72xbf16, #tpu.memory_space<vmem>>, vector<128x72xbf16>,
    return
  }
  func.func @transform_0(%arg0: i32, %arg1: i32) -> (i32, i32) {
    %c0_i32 = arith.constant 0 : i32
    %c0_i32_0 = arith.constant 0 : i32
    return %arg0, %c0_i32 : i32, i32
  }
  func.func @transform_1(%arg0: i32, %arg1: i32) -> (i32, i32) {
    %c0_i32 = arith.constant 0 : i32
    %c0_i32_0 = arith.constant 0 : i32
    return %c0_i32, %arg1 : i32, i32
  }
  func.func @transform_2(%arg0: i32, %arg1: i32) -> (i32, i32) {
    %c0_i32 = arith.constant 0 : i32
    return %arg0, %arg1 : i32, i32
  }
}

module attributes {stable_mosaic.version = 11 : i64} {
  func.func @kernel(%arg0: i32, %arg1: i32, %arg2: memref<128x24xbf16, #tpu.memory_space<vmem>>, %arg3: memref<24x16xbf16, #tpu.memory_space<vmem>>, %arg4: memref<1x24xbf16, #tpu.memory_space<vmem>>, %arg5: memref<1x24xbf16, #tpu.memory_space<vmem>>, %arg6: memref<1x16xf32, #tpu.memory_space<vmem>>, %arg7: memref<1x16xf32, #tpu.memory_space<vmem>>, %arg8: memref<128x16xbf16, #tpu.memory_space<vmem>>) attributes {dimension_semantics = [#tpu.dimension_semantics<parallel>, #tpu.dimension_semantics<parallel>], iteration_bounds = array<i64: 1, 1>, scalar_prefetch = 0 : i64, scratch_operands = 0 : i64, tpu.core_type = #tpu.core_type<tc>, window_params = [{transform_indices = @transform_0, window_bounds = array<i64: 128, 24>}, {transform_indices = @transform_1, window_bounds = array<i64: 24, 16>}, {pipeline_mode = #tpu.pipeline_mode<synchronous>, transform_indices = @transform_2, window_bounds = array<i64: 1, 24>}, {pipeline_mode = #tpu.pipeline_mode<synchronous>, transform_indices = @transform_3, window_bounds = array<i64: 1, 24>}, {transform_indices = @transform_4, window_bounds = array<i64: 1, 16>}, {transform_indices = @transform_5, window_bounds = array<i64: 1, 16>}, {transform_indices = @transform_6, window_bounds = array<i64: 128, 16>}]} {
    %c0 = arith.constant 0 : index
    %c0_0 = arith.constant 0 : index
    %0 = vector.load %arg2[%c0, %c0_0] : memref<128x24xbf16, #tpu.memory_space<vmem>>, vector<128x24xbf16>
    %c0_1 = arith.constant 0 : index
    %c0_2 = arith.constant 0 : index
    %1 = vector.load %arg4[%c0_1, %c0_2] : memref<1x24xbf16, #tpu.memory_space<vmem>>, vector<1x24xbf16>
    %2 = vector.broadcast %1 : vector<1x24xbf16> to vector<128x24xbf16>
    %3 = arith.mulf %0, %2 : vector<128x24xbf16>
    %c0_3 = arith.constant 0 : index
    %c0_4 = arith.constant 0 : index
    %4 = vector.load %arg5[%c0_3, %c0_4] : memref<1x24xbf16, #tpu.memory_space<vmem>>, vector<1x24xbf16>
    %5 = vector.broadcast %4 : vector<1x24xbf16> to vector<128x24xbf16>
    %6 = arith.addf %3, %5 : vector<128x24xbf16>
    %cst = arith.constant 0.000000e+00 : bf16
    %7 = vector.broadcast %cst : bf16 to vector<128x24xbf16>
    %8 = arith.maximumf %6, %7 : vector<128x24xbf16>
    %c0_5 = arith.constant 0 : index
    %c0_6 = arith.constant 0 : index
    %9 = vector.load %arg3[%c0_5, %c0_6] : memref<24x16xbf16, #tpu.memory_space<vmem>>, vector<24x16xbf16>
    %cst_7 = arith.constant dense<0.000000e+00> : vector<128x16xf32>
    %10 = tpu.matmul %8, %9, %cst_7 {dimension_numbers = #tpu.dot_dimension_numbers<[1], [0], [0], [1], [0, 0, 1, 1], [], []>} : vector<128x24xbf16>, vector<24x16xbf16>, vector<128x16xf32> -> vector<128x16xf32>
    %c0_8 = arith.constant 0 : index
    %c0_9 = arith.constant 0 : index
    %11 = vector.load %arg6[%c0_8, %c0_9] : memref<1x16xf32, #tpu.memory_space<vmem>>, vector<1x16xf32>
    %12 = vector.broadcast %11 : vector<1x16xf32> to vector<128x16xf32>
    %13 = arith.mulf %10, %12 : vector<128x16xf32>
    %c0_10 = arith.constant 0 : index
    %c0_11 = arith.constant 0 : index
    %14 = vector.load %arg7[%c0_10, %c0_11] : memref<1x16xf32, #tpu.memory_space<vmem>>, vector<1x16xf32>
    %15 = vector.broadcast %14 : vector<1x16xf32> to vector<128x16xf32>
    %16 = arith.addf %13, %15 : vector<128x16xf32>
    %cst_12 = arith.constant 0.000000e+00 : f32
    %17 = vector.broadcast %cst_12 : f32 to vector<128x16xf32>
    %18 = arith.maximumf %16, %17 : vector<128x16xf32>
    %19 = arith.truncf %18 : vector<128x16xf32> to vector<128x16xbf16>
    %c0_13 = arith.constant 0 : index
    %c0_14 = arith.constant 0 : index
    %20 = vector.load %arg8[%c0_13, %c0_14] : memref<128x16xbf16, #tpu.memory_space<vmem>>, vector<128x16xbf16>
    tpu.vector_store %arg8[%c0_13, %c0_14], %19 {strides = array<i32>} : memref<128x16xbf16, #tpu.memory_space<vmem>>, vector<128x16xbf16>,
    return
  }
  func.func @transform_0(%arg0: i32, %arg1: i32) -> (i32, i32) {
    %c0_i32 = arith.constant 0 : i32
    %c0_i32_0 = arith.constant 0 : i32
    return %arg0, %c0_i32 : i32, i32
  }
  func.func @transform_1(%arg0: i32, %arg1: i32) -> (i32, i32) {
    %c0_i32 = arith.constant 0 : i32
    %c0_i32_0 = arith.constant 0 : i32
    return %c0_i32, %arg1 : i32, i32
  }
  func.func @transform_2(%arg0: i32, %arg1: i32) -> (i32, i32) {
    %c0_i32 = arith.constant 0 : i32
    %c0_i32_0 = arith.constant 0 : i32
    %c0_i32_1 = arith.constant 0 : i32
    return %c0_i32, %c0_i32_0 : i32, i32
  }
  func.func @transform_3(%arg0: i32, %arg1: i32) -> (i32, i32) {
    %c0_i32 = arith.constant 0 : i32
    %c0_i32_0 = arith.constant 0 : i32
    %c0_i32_1 = arith.constant 0 : i32
    return %c0_i32, %c0_i32_0 : i32, i32
  }
  func.func @transform_4(%arg0: i32, %arg1: i32) -> (i32, i32) {
    %c0_i32 = arith.constant 0 : i32
    %c0_i32_0 = arith.constant 0 : i32
    return %c0_i32, %arg1 : i32, i32
  }
  func.func @transform_5(%arg0: i32, %arg1: i32) -> (i32, i32) {
    %c0_i32 = arith.constant 0 : i32
    %c0_i32_0 = arith.constant 0 : i32
    return %c0_i32, %arg1 : i32, i32
  }
  func.func @transform_6(%arg0: i32, %arg1: i32) -> (i32, i32) {
    %c0_i32 = arith.constant 0 : i32
    return %arg0, %arg1 : i32, i32
  }
}

module attributes {stable_mosaic.version = 11 : i64} {
  func.func @kernel(%arg0: i32, %arg1: i32, %arg2: memref<128x32xbf16, #tpu.memory_space<vmem>>, %arg3: memref<32x16xbf16, #tpu.memory_space<vmem>>, %arg4: memref<1x32xbf16, #tpu.memory_space<vmem>>, %arg5: memref<1x32xbf16, #tpu.memory_space<vmem>>, %arg6: memref<128x16xbf16, #tpu.memory_space<vmem>>) attributes {dimension_semantics = [#tpu.dimension_semantics<parallel>, #tpu.dimension_semantics<parallel>], iteration_bounds = array<i64: 1, 1>, scalar_prefetch = 0 : i64, scratch_operands = 0 : i64, tpu.core_type = #tpu.core_type<tc>, window_params = [{transform_indices = @transform_0, window_bounds = array<i64: 128, 32>}, {transform_indices = @transform_1, window_bounds = array<i64: 32, 16>}, {pipeline_mode = #tpu.pipeline_mode<synchronous>, transform_indices = @transform_2, window_bounds = array<i64: 1, 32>}, {pipeline_mode = #tpu.pipeline_mode<synchronous>, transform_indices = @transform_3, window_bounds = array<i64: 1, 32>}, {transform_indices = @transform_4, window_bounds = array<i64: 128, 16>}]} {
    %c0 = arith.constant 0 : index
    %c0_0 = arith.constant 0 : index
    %0 = vector.load %arg2[%c0, %c0_0] : memref<128x32xbf16, #tpu.memory_space<vmem>>, vector<128x32xbf16>
    %c0_1 = arith.constant 0 : index
    %c0_2 = arith.constant 0 : index
    %1 = vector.load %arg4[%c0_1, %c0_2] : memref<1x32xbf16, #tpu.memory_space<vmem>>, vector<1x32xbf16>
    %2 = vector.broadcast %1 : vector<1x32xbf16> to vector<128x32xbf16>
    %3 = arith.mulf %0, %2 : vector<128x32xbf16>
    %c0_3 = arith.constant 0 : index
    %c0_4 = arith.constant 0 : index
    %4 = vector.load %arg5[%c0_3, %c0_4] : memref<1x32xbf16, #tpu.memory_space<vmem>>, vector<1x32xbf16>
    %5 = vector.broadcast %4 : vector<1x32xbf16> to vector<128x32xbf16>
    %6 = arith.addf %3, %5 : vector<128x32xbf16>
    %cst = arith.constant 0.000000e+00 : bf16
    %7 = vector.broadcast %cst : bf16 to vector<128x32xbf16>
    %8 = arith.maximumf %6, %7 : vector<128x32xbf16>
    %c0_5 = arith.constant 0 : index
    %c0_6 = arith.constant 0 : index
    %9 = vector.load %arg3[%c0_5, %c0_6] : memref<32x16xbf16, #tpu.memory_space<vmem>>, vector<32x16xbf16>
    %cst_7 = arith.constant dense<0.000000e+00> : vector<128x16xf32>
    %10 = tpu.matmul %8, %9, %cst_7 {dimension_numbers = #tpu.dot_dimension_numbers<[1], [0], [0], [1], [0, 0, 1, 1], [], []>} : vector<128x32xbf16>, vector<32x16xbf16>, vector<128x16xf32> -> vector<128x16xf32>
    %11 = arith.truncf %10 : vector<128x16xf32> to vector<128x16xbf16>
    %c0_8 = arith.constant 0 : index
    %c0_9 = arith.constant 0 : index
    %12 = vector.load %arg6[%c0_8, %c0_9] : memref<128x16xbf16, #tpu.memory_space<vmem>>, vector<128x16xbf16>
    tpu.vector_store %arg6[%c0_8, %c0_9], %11 {strides = array<i32>} : memref<128x16xbf16, #tpu.memory_space<vmem>>, vector<128x16xbf16>,
    return
  }
  func.func @transform_0(%arg0: i32, %arg1: i32) -> (i32, i32) {
    %c0_i32 = arith.constant 0 : i32
    %c0_i32_0 = arith.constant 0 : i32
    return %arg0, %c0_i32 : i32, i32
  }
  func.func @transform_1(%arg0: i32, %arg1: i32) -> (i32, i32) {
    %c0_i32 = arith.constant 0 : i32
    %c0_i32_0 = arith.constant 0 : i32
    return %c0_i32, %arg1 : i32, i32
  }
  func.func @transform_2(%arg0: i32, %arg1: i32) -> (i32, i32) {
    %c0_i32 = arith.constant 0 : i32
    %c0_i32_0 = arith.constant 0 : i32
    %c0_i32_1 = arith.constant 0 : i32
    return %c0_i32, %c0_i32_0 : i32, i32
  }
  func.func @transform_3(%arg0: i32, %arg1: i32) -> (i32, i32) {
    %c0_i32 = arith.constant 0 : i32
    %c0_i32_0 = arith.constant 0 : i32
    %c0_i32_1 = arith.constant 0 : i32
    return %c0_i32, %c0_i32_0 : i32, i32
  }
  func.func @transform_4(%arg0: i32, %arg1: i32) -> (i32, i32) {
    %c0_i32 = arith.constant 0 : i32
    return %arg0, %arg1 : i32, i32
  }
}

module attributes {stable_mosaic.version = 11 : i64} {
  func.func @kernel(%arg0: i32, %arg1: i32, %arg2: memref<32x16xbf16, #tpu.memory_space<vmem>>, %arg3: memref<16x16xbf16, #tpu.memory_space<vmem>>, %arg4: memref<1x16xbf16, #tpu.memory_space<vmem>>, %arg5: memref<1x16xbf16, #tpu.memory_space<vmem>>, %arg6: memref<1x16xf32, #tpu.memory_space<vmem>>, %arg7: memref<1x16xf32, #tpu.memory_space<vmem>>, %arg8: memref<32x16xbf16, #tpu.memory_space<vmem>>) attributes {dimension_semantics = [#tpu.dimension_semantics<parallel>, #tpu.dimension_semantics<parallel>], iteration_bounds = array<i64: 1, 1>, scalar_prefetch = 0 : i64, scratch_operands = 0 : i64, tpu.core_type = #tpu.core_type<tc>, window_params = [{transform_indices = @transform_0, window_bounds = array<i64: 32, 16>}, {transform_indices = @transform_1, window_bounds = array<i64: 16, 16>}, {pipeline_mode = #tpu.pipeline_mode<synchronous>, transform_indices = @transform_2, window_bounds = array<i64: 1, 16>}, {pipeline_mode = #tpu.pipeline_mode<synchronous>, transform_indices = @transform_3, window_bounds = array<i64: 1, 16>}, {transform_indices = @transform_4, window_bounds = array<i64: 1, 16>}, {transform_indices = @transform_5, window_bounds = array<i64: 1, 16>}, {transform_indices = @transform_6, window_bounds = array<i64: 32, 16>}]} {
    %c0 = arith.constant 0 : index
    %c0_0 = arith.constant 0 : index
    %0 = vector.load %arg2[%c0, %c0_0] : memref<32x16xbf16, #tpu.memory_space<vmem>>, vector<32x16xbf16>
    %c0_1 = arith.constant 0 : index
    %c0_2 = arith.constant 0 : index
    %1 = vector.load %arg4[%c0_1, %c0_2] : memref<1x16xbf16, #tpu.memory_space<vmem>>, vector<1x16xbf16>
    %2 = vector.broadcast %1 : vector<1x16xbf16> to vector<32x16xbf16>
    %3 = arith.mulf %0, %2 : vector<32x16xbf16>
    %c0_3 = arith.constant 0 : index
    %c0_4 = arith.constant 0 : index
    %4 = vector.load %arg5[%c0_3, %c0_4] : memref<1x16xbf16, #tpu.memory_space<vmem>>, vector<1x16xbf16>
    %5 = vector.broadcast %4 : vector<1x16xbf16> to vector<32x16xbf16>
    %6 = arith.addf %3, %5 : vector<32x16xbf16>
    %cst = arith.constant 0.000000e+00 : bf16
    %7 = vector.broadcast %cst : bf16 to vector<32x16xbf16>
    %8 = arith.maximumf %6, %7 : vector<32x16xbf16>
    %c0_5 = arith.constant 0 : index
    %c0_6 = arith.constant 0 : index
    %9 = vector.load %arg3[%c0_5, %c0_6] : memref<16x16xbf16, #tpu.memory_space<vmem>>, vector<16x16xbf16>
    %cst_7 = arith.constant dense<0.000000e+00> : vector<32x16xf32>
    %10 = tpu.matmul %8, %9, %cst_7 {dimension_numbers = #tpu.dot_dimension_numbers<[1], [0], [0], [1], [0, 0, 1, 1], [], []>} : vector<32x16xbf16>, vector<16x16xbf16>, vector<32x16xf32> -> vector<32x16xf32>
    %c0_8 = arith.constant 0 : index
    %c0_9 = arith.constant 0 : index
    %11 = vector.load %arg6[%c0_8, %c0_9] : memref<1x16xf32, #tpu.memory_space<vmem>>, vector<1x16xf32>
    %12 = vector.broadcast %11 : vector<1x16xf32> to vector<32x16xf32>
    %13 = arith.mulf %10, %12 : vector<32x16xf32>
    %c0_10 = arith.constant 0 : index
    %c0_11 = arith.constant 0 : index
    %14 = vector.load %arg7[%c0_10, %c0_11] : memref<1x16xf32, #tpu.memory_space<vmem>>, vector<1x16xf32>
    %15 = vector.broadcast %14 : vector<1x16xf32> to vector<32x16xf32>
    %16 = arith.addf %13, %15 : vector<32x16xf32>
    %cst_12 = arith.constant 0.000000e+00 : f32
    %17 = vector.broadcast %cst_12 : f32 to vector<32x16xf32>
    %18 = arith.maximumf %16, %17 : vector<32x16xf32>
    %19 = arith.truncf %18 : vector<32x16xf32> to vector<32x16xbf16>
    %c0_13 = arith.constant 0 : index
    %c0_14 = arith.constant 0 : index
    %20 = vector.load %arg8[%c0_13, %c0_14] : memref<32x16xbf16, #tpu.memory_space<vmem>>, vector<32x16xbf16>
    tpu.vector_store %arg8[%c0_13, %c0_14], %19 {strides = array<i32>} : memref<32x16xbf16, #tpu.memory_space<vmem>>, vector<32x16xbf16>,
    return
  }
  func.func @transform_0(%arg0: i32, %arg1: i32) -> (i32, i32) {
    %c0_i32 = arith.constant 0 : i32
    %c0_i32_0 = arith.constant 0 : i32
    return %arg0, %c0_i32 : i32, i32
  }
  func.func @transform_1(%arg0: i32, %arg1: i32) -> (i32, i32) {
    %c0_i32 = arith.constant 0 : i32
    %c0_i32_0 = arith.constant 0 : i32
    return %c0_i32, %arg1 : i32, i32
  }
  func.func @transform_2(%arg0: i32, %arg1: i32) -> (i32, i32) {
    %c0_i32 = arith.constant 0 : i32
    %c0_i32_0 = arith.constant 0 : i32
    %c0_i32_1 = arith.constant 0 : i32
    return %c0_i32, %c0_i32_0 : i32, i32
  }
  func.func @transform_3(%arg0: i32, %arg1: i32) -> (i32, i32) {
    %c0_i32 = arith.constant 0 : i32
    %c0_i32_0 = arith.constant 0 : i32
    %c0_i32_1 = arith.constant 0 : i32
    return %c0_i32, %c0_i32_0 : i32, i32
  }
  func.func @transform_4(%arg0: i32, %arg1: i32) -> (i32, i32) {
    %c0_i32 = arith.constant 0 : i32
    %c0_i32_0 = arith.constant 0 : i32
    return %c0_i32, %arg1 : i32, i32
  }
  func.func @transform_5(%arg0: i32, %arg1: i32) -> (i32, i32) {
    %c0_i32 = arith.constant 0 : i32
    %c0_i32_0 = arith.constant 0 : i32
    return %c0_i32, %arg1 : i32, i32
  }
  func.func @transform_6(%arg0: i32, %arg1: i32) -> (i32, i32) {
    %c0_i32 = arith.constant 0 : i32
    return %arg0, %arg1 : i32, i32
  }
}

module attributes {stable_mosaic.version = 11 : i64} {
  func.func @kernel(%arg0: i32, %arg1: i32, %arg2: memref<32x16xbf16, #tpu.memory_space<vmem>>, %arg3: memref<16x72xbf16, #tpu.memory_space<vmem>>, %arg4: memref<32x72xbf16, #tpu.memory_space<vmem>>) attributes {dimension_semantics = [#tpu.dimension_semantics<parallel>, #tpu.dimension_semantics<parallel>], iteration_bounds = array<i64: 1, 1>, scalar_prefetch = 0 : i64, scratch_operands = 0 : i64, tpu.core_type = #tpu.core_type<tc>, window_params = [{transform_indices = @transform_0, window_bounds = array<i64: 32, 16>}, {transform_indices = @transform_1, window_bounds = array<i64: 16, 72>}, {transform_indices = @transform_2, window_bounds = array<i64: 32, 72>}]} {
    %c0 = arith.constant 0 : index
    %c0_0 = arith.constant 0 : index
    %0 = vector.load %arg2[%c0, %c0_0] : memref<32x16xbf16, #tpu.memory_space<vmem>>, vector<32x16xbf16>
    %c0_1 = arith.constant 0 : index
    %c0_2 = arith.constant 0 : index
    %1 = vector.load %arg3[%c0_1, %c0_2] : memref<16x72xbf16, #tpu.memory_space<vmem>>, vector<16x72xbf16>
    %cst = arith.constant dense<0.000000e+00> : vector<32x72xf32>
    %2 = tpu.matmul %0, %1, %cst {dimension_numbers = #tpu.dot_dimension_numbers<[1], [0], [0], [1], [0, 0, 1, 1], [], []>} : vector<32x16xbf16>, vector<16x72xbf16>, vector<32x72xf32> -> vector<32x72xf32>
    %3 = arith.truncf %2 : vector<32x72xf32> to vector<32x72xbf16>
    %c0_3 = arith.constant 0 : index
    %c0_4 = arith.constant 0 : index
    %4 = vector.load %arg4[%c0_3, %c0_4] : memref<32x72xbf16, #tpu.memory_space<vmem>>, vector<32x72xbf16>
    tpu.vector_store %arg4[%c0_3, %c0_4], %3 {strides = array<i32>} : memref<32x72xbf16, #tpu.memory_space<vmem>>, vector<32x72xbf16>,
    return
  }
  func.func @transform_0(%arg0: i32, %arg1: i32) -> (i32, i32) {
    %c0_i32 = arith.constant 0 : i32
    %c0_i32_0 = arith.constant 0 : i32
    return %arg0, %c0_i32 : i32, i32
  }
  func.func @transform_1(%arg0: i32, %arg1: i32) -> (i32, i32) {
    %c0_i32 = arith.constant 0 : i32
    %c0_i32_0 = arith.constant 0 : i32
    return %c0_i32, %arg1 : i32, i32
  }
  func.func @transform_2(%arg0: i32, %arg1: i32) -> (i32, i32) {
    %c0_i32 = arith.constant 0 : i32
    return %arg0, %arg1 : i32, i32
  }
}

module attributes {stable_mosaic.version = 11 : i64} {
  func.func @kernel(%arg0: i32, %arg1: i32, %arg2: memref<32x24xbf16, #tpu.memory_space<vmem>>, %arg3: memref<24x16xbf16, #tpu.memory_space<vmem>>, %arg4: memref<1x24xbf16, #tpu.memory_space<vmem>>, %arg5: memref<1x24xbf16, #tpu.memory_space<vmem>>, %arg6: memref<1x16xf32, #tpu.memory_space<vmem>>, %arg7: memref<1x16xf32, #tpu.memory_space<vmem>>, %arg8: memref<32x16xbf16, #tpu.memory_space<vmem>>) attributes {dimension_semantics = [#tpu.dimension_semantics<parallel>, #tpu.dimension_semantics<parallel>], iteration_bounds = array<i64: 1, 1>, scalar_prefetch = 0 : i64, scratch_operands = 0 : i64, tpu.core_type = #tpu.core_type<tc>, window_params = [{transform_indices = @transform_0, window_bounds = array<i64: 32, 24>}, {transform_indices = @transform_1, window_bounds = array<i64: 24, 16>}, {pipeline_mode = #tpu.pipeline_mode<synchronous>, transform_indices = @transform_2, window_bounds = array<i64: 1, 24>}, {pipeline_mode = #tpu.pipeline_mode<synchronous>, transform_indices = @transform_3, window_bounds = array<i64: 1, 24>}, {transform_indices = @transform_4, window_bounds = array<i64: 1, 16>}, {transform_indices = @transform_5, window_bounds = array<i64: 1, 16>}, {transform_indices = @transform_6, window_bounds = array<i64: 32, 16>}]} {
    %c0 = arith.constant 0 : index
    %c0_0 = arith.constant 0 : index
    %0 = vector.load %arg2[%c0, %c0_0] : memref<32x24xbf16, #tpu.memory_space<vmem>>, vector<32x24xbf16>
    %c0_1 = arith.constant 0 : index
    %c0_2 = arith.constant 0 : index
    %1 = vector.load %arg4[%c0_1, %c0_2] : memref<1x24xbf16, #tpu.memory_space<vmem>>, vector<1x24xbf16>
    %2 = vector.broadcast %1 : vector<1x24xbf16> to vector<32x24xbf16>
    %3 = arith.mulf %0, %2 : vector<32x24xbf16>
    %c0_3 = arith.constant 0 : index
    %c0_4 = arith.constant 0 : index
    %4 = vector.load %arg5[%c0_3, %c0_4] : memref<1x24xbf16, #tpu.memory_space<vmem>>, vector<1x24xbf16>
    %5 = vector.broadcast %4 : vector<1x24xbf16> to vector<32x24xbf16>
    %6 = arith.addf %3, %5 : vector<32x24xbf16>
    %cst = arith.constant 0.000000e+00 : bf16
    %7 = vector.broadcast %cst : bf16 to vector<32x24xbf16>
    %8 = arith.maximumf %6, %7 : vector<32x24xbf16>
    %c0_5 = arith.constant 0 : index
    %c0_6 = arith.constant 0 : index
    %9 = vector.load %arg3[%c0_5, %c0_6] : memref<24x16xbf16, #tpu.memory_space<vmem>>, vector<24x16xbf16>
    %cst_7 = arith.constant dense<0.000000e+00> : vector<32x16xf32>
    %10 = tpu.matmul %8, %9, %cst_7 {dimension_numbers = #tpu.dot_dimension_numbers<[1], [0], [0], [1], [0, 0, 1, 1], [], []>} : vector<32x24xbf16>, vector<24x16xbf16>, vector<32x16xf32> -> vector<32x16xf32>
    %c0_8 = arith.constant 0 : index
    %c0_9 = arith.constant 0 : index
    %11 = vector.load %arg6[%c0_8, %c0_9] : memref<1x16xf32, #tpu.memory_space<vmem>>, vector<1x16xf32>
    %12 = vector.broadcast %11 : vector<1x16xf32> to vector<32x16xf32>
    %13 = arith.mulf %10, %12 : vector<32x16xf32>
    %c0_10 = arith.constant 0 : index
    %c0_11 = arith.constant 0 : index
    %14 = vector.load %arg7[%c0_10, %c0_11] : memref<1x16xf32, #tpu.memory_space<vmem>>, vector<1x16xf32>
    %15 = vector.broadcast %14 : vector<1x16xf32> to vector<32x16xf32>
    %16 = arith.addf %13, %15 : vector<32x16xf32>
    %cst_12 = arith.constant 0.000000e+00 : f32
    %17 = vector.broadcast %cst_12 : f32 to vector<32x16xf32>
    %18 = arith.maximumf %16, %17 : vector<32x16xf32>
    %19 = arith.truncf %18 : vector<32x16xf32> to vector<32x16xbf16>
    %c0_13 = arith.constant 0 : index
    %c0_14 = arith.constant 0 : index
    %20 = vector.load %arg8[%c0_13, %c0_14] : memref<32x16xbf16, #tpu.memory_space<vmem>>, vector<32x16xbf16>
    tpu.vector_store %arg8[%c0_13, %c0_14], %19 {strides = array<i32>} : memref<32x16xbf16, #tpu.memory_space<vmem>>, vector<32x16xbf16>,
    return
  }
  func.func @transform_0(%arg0: i32, %arg1: i32) -> (i32, i32) {
    %c0_i32 = arith.constant 0 : i32
    %c0_i32_0 = arith.constant 0 : i32
    return %arg0, %c0_i32 : i32, i32
  }
  func.func @transform_1(%arg0: i32, %arg1: i32) -> (i32, i32) {
    %c0_i32 = arith.constant 0 : i32
    %c0_i32_0 = arith.constant 0 : i32
    return %c0_i32, %arg1 : i32, i32
  }
  func.func @transform_2(%arg0: i32, %arg1: i32) -> (i32, i32) {
    %c0_i32 = arith.constant 0 : i32
    %c0_i32_0 = arith.constant 0 : i32
    %c0_i32_1 = arith.constant 0 : i32
    return %c0_i32, %c0_i32_0 : i32, i32
  }
  func.func @transform_3(%arg0: i32, %arg1: i32) -> (i32, i32) {
    %c0_i32 = arith.constant 0 : i32
    %c0_i32_0 = arith.constant 0 : i32
    %c0_i32_1 = arith.constant 0 : i32
    return %c0_i32, %c0_i32_0 : i32, i32
  }
  func.func @transform_4(%arg0: i32, %arg1: i32) -> (i32, i32) {
    %c0_i32 = arith.constant 0 : i32
    %c0_i32_0 = arith.constant 0 : i32
    return %c0_i32, %arg1 : i32, i32
  }
  func.func @transform_5(%arg0: i32, %arg1: i32) -> (i32, i32) {
    %c0_i32 = arith.constant 0 : i32
    %c0_i32_0 = arith.constant 0 : i32
    return %c0_i32, %arg1 : i32, i32
  }
  func.func @transform_6(%arg0: i32, %arg1: i32) -> (i32, i32) {
    %c0_i32 = arith.constant 0 : i32
    return %arg0, %arg1 : i32, i32
  }
}

module attributes {stable_mosaic.version = 11 : i64} {
  func.func @_bn_relu_kernel(%arg0: i32, %arg1: memref<32x32xbf16, #tpu.memory_space<vmem>>, %arg2: memref<1x32xf32, #tpu.memory_space<vmem>>, %arg3: memref<1x32xf32, #tpu.memory_space<vmem>>, %arg4: memref<32x32xbf16, #tpu.memory_space<vmem>>) attributes {dimension_semantics = [#tpu.dimension_semantics<parallel>], iteration_bounds = array<i64: 1>, scalar_prefetch = 0 : i64, scratch_operands = 0 : i64, tpu.core_type = #tpu.core_type<tc>, window_params = [{transform_indices = @transform_0, window_bounds = array<i64: 32, 32>}, {pipeline_mode = #tpu.pipeline_mode<synchronous>, transform_indices = @transform_1, window_bounds = array<i64: 1, 32>}, {pipeline_mode = #tpu.pipeline_mode<synchronous>, transform_indices = @transform_2, window_bounds = array<i64: 1, 32>}, {transform_indices = @transform_3, window_bounds = array<i64: 32, 32>}]} {
    %c0 = arith.constant 0 : index
    %c0_0 = arith.constant 0 : index
    %0 = vector.load %arg1[%c0, %c0_0] : memref<32x32xbf16, #tpu.memory_space<vmem>>, vector<32x32xbf16>
    %1 = arith.extf %0 : vector<32x32xbf16> to vector<32x32xf32>
    %c0_1 = arith.constant 0 : index
    %c0_2 = arith.constant 0 : index
    %2 = vector.load %arg2[%c0_1, %c0_2] : memref<1x32xf32, #tpu.memory_space<vmem>>, vector<1x32xf32>
    %3 = vector.broadcast %2 : vector<1x32xf32> to vector<32x32xf32>
    %4 = arith.mulf %1, %3 : vector<32x32xf32>
    %c0_3 = arith.constant 0 : index
    %c0_4 = arith.constant 0 : index
    %5 = vector.load %arg3[%c0_3, %c0_4] : memref<1x32xf32, #tpu.memory_space<vmem>>, vector<1x32xf32>
    %6 = vector.broadcast %5 : vector<1x32xf32> to vector<32x32xf32>
    %7 = arith.addf %4, %6 : vector<32x32xf32>
    %cst = arith.constant 0.000000e+00 : f32
    %8 = vector.broadcast %cst : f32 to vector<32x32xf32>
    %9 = arith.maximumf %7, %8 : vector<32x32xf32>
    %10 = arith.truncf %9 : vector<32x32xf32> to vector<32x32xbf16>
    %c0_5 = arith.constant 0 : index
    %c0_6 = arith.constant 0 : index
    %11 = vector.load %arg4[%c0_5, %c0_6] : memref<32x32xbf16, #tpu.memory_space<vmem>>, vector<32x32xbf16>
    tpu.vector_store %arg4[%c0_5, %c0_6], %10 {strides = array<i32>} : memref<32x32xbf16, #tpu.memory_space<vmem>>, vector<32x32xbf16>,
    return
  }
  func.func @transform_0(%arg0: i32) -> (i32, i32) {
    %c0_i32 = arith.constant 0 : i32
    %c0_i32_0 = arith.constant 0 : i32
    return %arg0, %c0_i32 : i32, i32
  }
  func.func @transform_1(%arg0: i32) -> (i32, i32) {
    %c0_i32 = arith.constant 0 : i32
    %c0_i32_0 = arith.constant 0 : i32
    %c0_i32_1 = arith.constant 0 : i32
    return %c0_i32, %c0_i32_0 : i32, i32
  }
  func.func @transform_2(%arg0: i32) -> (i32, i32) {
    %c0_i32 = arith.constant 0 : i32
    %c0_i32_0 = arith.constant 0 : i32
    %c0_i32_1 = arith.constant 0 : i32
    return %c0_i32, %c0_i32_0 : i32, i32
  }
  func.func @transform_3(%arg0: i32) -> (i32, i32) {
    %c0_i32 = arith.constant 0 : i32
    %c0_i32_0 = arith.constant 0 : i32
    return %arg0, %c0_i32 : i32, i32
  }
}

module attributes {stable_mosaic.version = 11 : i64} {
  func.func @_classifier_kernel(%arg0: i32, %arg1: memref<2x32xbf16, #tpu.memory_space<vmem>>, %arg2: memref<32x2xbf16, #tpu.memory_space<vmem>>, %arg3: memref<1x2xf32, #tpu.memory_space<vmem>>, %arg4: memref<2x2xf32, #tpu.memory_space<vmem>>) attributes {dimension_semantics = [#tpu.dimension_semantics<arbitrary>], iteration_bounds = array<i64: 1>, scalar_prefetch = 0 : i64, scratch_operands = 0 : i64, tpu.core_type = #tpu.core_type<tc>, window_params = [{pipeline_mode = #tpu.pipeline_mode<synchronous>, transform_indices = @transform_0, window_bounds = array<i64: 2, 32>}, {pipeline_mode = #tpu.pipeline_mode<synchronous>, transform_indices = @transform_1, window_bounds = array<i64: 32, 2>}, {pipeline_mode = #tpu.pipeline_mode<synchronous>, transform_indices = @transform_2, window_bounds = array<i64: 1, 2>}, {pipeline_mode = #tpu.pipeline_mode<synchronous>, transform_indices = @transform_3, window_bounds = array<i64: 2, 2>}]} {
    %c0 = arith.constant 0 : index
    %c0_0 = arith.constant 0 : index
    %0 = vector.load %arg1[%c0, %c0_0] : memref<2x32xbf16, #tpu.memory_space<vmem>>, vector<2x32xbf16>
    %c0_1 = arith.constant 0 : index
    %c0_2 = arith.constant 0 : index
    %1 = vector.load %arg2[%c0_1, %c0_2] : memref<32x2xbf16, #tpu.memory_space<vmem>>, vector<32x2xbf16>
    %cst = arith.constant dense<0.000000e+00> : vector<2x2xf32>
    %2 = tpu.matmul %0, %1, %cst {dimension_numbers = #tpu.dot_dimension_numbers<[1], [0], [0], [1], [0, 0, 1, 1], [], []>} : vector<2x32xbf16>, vector<32x2xbf16>, vector<2x2xf32> -> vector<2x2xf32>
    %c0_3 = arith.constant 0 : index
    %c0_4 = arith.constant 0 : index
    %3 = vector.load %arg3[%c0_3, %c0_4] : memref<1x2xf32, #tpu.memory_space<vmem>>, vector<1x2xf32>
    %4 = vector.broadcast %3 : vector<1x2xf32> to vector<2x2xf32>
    %5 = arith.addf %2, %4 : vector<2x2xf32>
    %6 = arith.negf %5 : vector<2x2xf32>
    %7 = math.exp %6 : vector<2x2xf32>
    %cst_5 = arith.constant 1.000000e+00 : f32
    %8 = vector.broadcast %cst_5 : f32 to vector<2x2xf32>
    %9 = arith.addf %8, %7 : vector<2x2xf32>
    %10 = arith.divf %8, %9 : vector<2x2xf32>
    %c0_6 = arith.constant 0 : index
    %c0_7 = arith.constant 0 : index
    %11 = vector.load %arg4[%c0_6, %c0_7] : memref<2x2xf32, #tpu.memory_space<vmem>>, vector<2x2xf32>
    tpu.vector_store %arg4[%c0_6, %c0_7], %10 {strides = array<i32>} : memref<2x2xf32, #tpu.memory_space<vmem>>, vector<2x2xf32>,
    return
  }
  func.func @transform_0(%arg0: i32) -> (i32, i32) {
    %c0_i32 = arith.constant 0 : i32
    %c0_i32_0 = arith.constant 0 : i32
    %c0_i32_1 = arith.constant 0 : i32
    return %c0_i32, %c0_i32_0 : i32, i32
  }
  func.func @transform_1(%arg0: i32) -> (i32, i32) {
    %c0_i32 = arith.constant 0 : i32
    %c0_i32_0 = arith.constant 0 : i32
    %c0_i32_1 = arith.constant 0 : i32
    return %c0_i32, %c0_i32_0 : i32, i32
  }
  func.func @transform_2(%arg0: i32) -> (i32, i32) {
    %c0_i32 = arith.constant 0 : i32
    %c0_i32_0 = arith.constant 0 : i32
    %c0_i32_1 = arith.constant 0 : i32
    return %c0_i32, %c0_i32_0 : i32, i32
  }
  func.func @transform_3(%arg0: i32) -> (i32, i32) {
    %c0_i32 = arith.constant 0 : i32
    %c0_i32_0 = arith.constant 0 : i32
    %c0_i32_1 = arith.constant 0 : i32
    return %c0_i32, %c0_i32_0 : i32, i32
  }
}

</mosaic_0001>

<bundles_post_ra>
// kernel: densenet_forward.12
= control target key start
LH: loop header
LB: loop body
LE: loop exit
PB: predicated region body
PF: predicated region fallthrough
CT: control target
= control target key end

     0   :  { %vm540_vm0 = vcmask 125952   ;;  %s1345_s0 = inlined_call_operand.vmem [shape: f32[512,16], index: 0, kind: input, shape index: {}]   ;;  %s1346_s1 = inlined_call_operand.vmem [shape: f32[1,16], index: 1, kind: input, shape index: {}]   ;;  %s1347_s2 = inlined_call_operand.vmem [shape: f32[1,16], index: 2, kind: input, shape index: {}]   ;;  %s1348_s3 = inlined_call_operand.vmem [shape: bf16[512,16], index: 3, kind: output, shape index: {}]  }
   0x1   :  { %v14_v0 = vld [vmem:[%s1345_s0] sm:$0xff]  ;;  %v15_v4 = vld [vmem:[%s1345_s0 + $0x8] sm:$0xff]  ;;  %v16_v5 = vld [vmem:[%s1345_s0 + $0x10] sm:$0xff] }
   0x2   :  { %v765_v1 = vld [vmem:[%s1346_s1] ss:$0 sm:$0xff]  ;;  %v17_v6 = vld [vmem:[%s1345_s0 + $0x18] sm:$0xff]  ;;  %v19_v11 = vld [vmem:[%s1345_s0 + $0x28] sm:$0xff] }
   0x3   :  { %v770_v2 = vld [vmem:[%s1347_s2] ss:$0 sm:$0xff]  ;;  %v85_v3 = vmul.f32 %v765_v1, %v14_v0  ;;  %v86_v7 = vmul.f32 %v765_v1, %v15_v4  ;;  %v87_v8 = vmul.f32 %v765_v1, %v16_v5  ;;  %v88_v9 = vmul.f32 %v765_v1, %v17_v6  ;;  %v20_v12 = vld [vmem:[%s1345_s0 + $0x30] sm:$0xff]  ;;  %v21_v17 = vld [vmem:[%s1345_s0 + $0x38] sm:$0xff] }
   0x4   :  { %v18_v10 = vld [vmem:[%s1345_s0 + $0x20] sm:$0xff]  ;;  %v90_v15 = vmul.f32 %v765_v1, %v19_v11  ;;  %v91_v16 = vmul.f32 %v765_v1, %v20_v12  ;;  %v92_v21 = vmul.f32 %v765_v1, %v21_v17  ;;  %v23_v35 = vld [vmem:[%s1345_s0 + $0x48] sm:$0xff]  ;;  %v24_v36 = vld [vmem:[%s1345_s0 + $0x50] sm:$0xff] }
   0x5   :  { %v156_v13 = vadd.f32 %v770_v2, %v85_v3  ;;  %v89_v14 = vmul.f32 %v765_v1, %v18_v10  ;;  %v157_v18 = vadd.f32 %v770_v2, %v86_v7  ;;  %v158_v19 = vadd.f32 %v770_v2, %v87_v8  ;;  %v22_v30 = vld [vmem:[%s1345_s0 + $0x40] sm:$0xff]  ;;  %v25_v37 = vld [vmem:[%s1345_s0 + $0x58] sm:$0xff]  ;;  %v27_v43 = vld [vmem:[%s1345_s0 + $0x68] sm:$0xff] }
   0x6   :  { %v159_v20 = vadd.f32 %v770_v2, %v88_v9  ;;  %v161_v24 = vadd.f32 %v770_v2, %v90_v15  ;;  %v162_v25 = vadd.f32 %v770_v2, %v91_v16  ;;  %v163_v29 = vadd.f32 %v770_v2, %v92_v21  ;;  %v26_v42 = vld [vmem:[%s1345_s0 + $0x60] sm:$0xff]  ;;  %v28_v44 = vld [vmem:[%s1345_s0 + $0x70] sm:$0xff]  ;;  %v29_v49 = vld [vmem:[%s1345_s0 + $0x78] sm:$0xff] }
   0x7   :  { %v220_v22 = vmax.f32 %v156_v13, 0.0  ;;  %v160_v23 = vadd.f32 %v770_v2, %v89_v14  ;;  %v221_v26 = vmax.f32 %v157_v18, 0.0  ;;  %v222_v27 = vmax.f32 %v158_v19, 0.0  ;;  %v30_v8 = vld [vmem:[%s1345_s0 + $0x80] sm:$0xff]  ;;  %v31_v13 = vld [vmem:[%s1345_s0 + $0x88] sm:$0xff]  ;;  %v32_v14 = vld [vmem:[%s1345_s0 + $0x90] sm:$0xff] }
   0x8   :  { %v223_v28 = vmax.f32 %v159_v20, 0.0  ;;  %v225_v33 = vmax.f32 %v161_v24, 0.0  ;;  %v226_v34 = vmax.f32 %v162_v25, 0.0  ;;  %v227_v41 = vmax.f32 %v163_v29, 0.0  ;;  %v33_v15 = vld [vmem:[%s1345_s0 + $0x98] sm:$0xff]  ;;  %v34_v20 = vld [vmem:[%s1345_s0 + $0xa0] sm:$0xff] }
   0x9   :  { %v675_v31 = vpack.c.bf16 %v220_v22, %v220_v22  ;;  %v224_v32 = vmax.f32 %v160_v23, 0.0  ;;  %v676_v38 = vpack.c.bf16 %v221_v26, %v221_v26  ;;  %v677_v39 = vpack.c.bf16 %v222_v27, %v222_v27  ;;  %v35_v21 = vld [vmem:[%s1345_s0 + $0xa8] sm:$0xff]  ;;  %v36_v22 = vld [vmem:[%s1345_s0 + $0xb0] sm:$0xff]  ;;  %v37_v27 = vld [vmem:[%s1345_s0 + $0xb8] sm:$0xff] }
   0xa   :  { %v678_v40 = vpack.c.bf16 %v223_v28, %v223_v28  ;;  %v680_v46 = vpack.c.bf16 %v225_v33, %v225_v33  ;;  %v681_v47 = vpack.c.bf16 %v226_v34, %v226_v34  ;;  %v93_v48 = vmul.f32 %v765_v1, %v22_v30 }
   0xb   :  { %541 = vst.msk [vmem:[%s1348_s3] sm:$0xf] %vm540_vm0, %v675_v31  ;;  %v679_v45 = vpack.c.bf16 %v224_v32, %v224_v32  ;;  %542 = vst.msk [vmem:[%s1348_s3 + $0x4] sm:$0xf] %vm540_vm0, %v676_v38  ;;  %v682_v50 = vpack.c.bf16 %v227_v41, %v227_v41  ;;  %v94_v51 = vmul.f32 %v765_v1, %v23_v35 }
   0xc   :  { %543 = vst.msk [vmem:[%s1348_s3 + $0x8] sm:$0xf] %vm540_vm0, %v677_v39  ;;  %544 = vst.msk [vmem:[%s1348_s3 + $0xc] sm:$0xf] %vm540_vm0, %v678_v40  ;;  %v95_v52 = vmul.f32 %v765_v1, %v24_v36  ;;  %v96_v53 = vmul.f32 %v765_v1, %v25_v37  ;;  %v164_v54 = vadd.f32 %v770_v2, %v93_v48  ;;  %v38_v48 = vld [vmem:[%s1345_s0 + $0xc0] sm:$0xff] }
   0xd   :  { %545 = vst.msk [vmem:[%s1348_s3 + $0x10] sm:$0xf] %vm540_vm0, %v679_v45  ;;  %546 = vst.msk [vmem:[%s1348_s3 + $0x14] sm:$0xf] %vm540_vm0, %v680_v46  ;;  %v97_v55 = vmul.f32 %v765_v1, %v26_v42  ;;  %v98_v56 = vmul.f32 %v765_v1, %v27_v43  ;;  %v99_v57 = vmul.f32 %v765_v1, %v28_v44 }
   0xe   :  { %547 = vst.msk [vmem:[%s1348_s3 + $0x18] sm:$0xf] %vm540_vm0, %v681_v47  ;;  %548 = vst.msk [vmem:[%s1348_s3 + $0x1c] sm:$0xf] %vm540_vm0, %v682_v50  ;;  %v165_v58 = vadd.f32 %v770_v2, %v94_v51  ;;  %v166_v59 = vadd.f32 %v770_v2, %v95_v52  ;;  %v167_v60 = vadd.f32 %v770_v2, %v96_v53  ;;  %v228_v62 = vmax.f32 %v164_v54, 0.0  ;;  %v39_v53 = vld [vmem:[%s1345_s0 + $0xc8] sm:$0xff] }
   0xf   :  { %v100_v61 = vmul.f32 %v765_v1, %v29_v49  ;;  %v168_v63 = vadd.f32 %v770_v2, %v97_v55  ;;  %v169_v0 = vadd.f32 %v770_v2, %v98_v56  ;;  %v170_v3 = vadd.f32 %v770_v2, %v99_v57  ;;  %v40_v54 = vld [vmem:[%s1345_s0 + $0xd0] sm:$0xff]  ;;  %v41_v55 = vld [vmem:[%s1345_s0 + $0xd8] sm:$0xff] }
  0x10   :  { %v229_v4 = vmax.f32 %v165_v58, 0.0  ;;  %v230_v5 = vmax.f32 %v166_v59, 0.0  ;;  %v231_v6 = vmax.f32 %v167_v60, 0.0  ;;  %v683_v9 = vpack.c.bf16 %v228_v62, %v228_v62  ;;  %v42_v60 = vld [vmem:[%s1345_s0 + $0xe0] sm:$0xff]  ;;  %v44_v62 = vld [vmem:[%s1345_s0 + $0xf0] sm:$0xff] }
  0x11   :  { %v171_v7 = vadd.f32 %v770_v2, %v100_v61  ;;  %v232_v10 = vmax.f32 %v168_v63, 0.0  ;;  %v233_v11 = vmax.f32 %v169_v0, 0.0  ;;  %v234_v12 = vmax.f32 %v170_v3, 0.0  ;;  %v43_v61 = vld [vmem:[%s1345_s0 + $0xe8] sm:$0xff] }
  0x12   :  { %v684_v16 = vpack.c.bf16 %v229_v4, %v229_v4  ;;  %v685_v17 = vpack.c.bf16 %v230_v5, %v230_v5  ;;  %v686_v18 = vpack.c.bf16 %v231_v6, %v231_v6  ;;  %549 = vst.msk [vmem:[%s1348_s3 + $0x20] sm:$0xf] %vm540_vm0, %v683_v9  ;;  %v101_v26 = vmul.f32 %v765_v1, %v30_v8  ;;  %v45_v5 = vld [vmem:[%s1345_s0 + $0xf8] sm:$0xff] }
  0x13   :  { %v235_v19 = vmax.f32 %v171_v7, 0.0  ;;  %v687_v23 = vpack.c.bf16 %v232_v10, %v232_v10  ;;  %v688_v24 = vpack.c.bf16 %v233_v11, %v233_v11  ;;  %v689_v25 = vpack.c.bf16 %v234_v12, %v234_v12 }
  0x14   :  { %550 = vst.msk [vmem:[%s1348_s3 + $0x24] sm:$0xf] %vm540_vm0, %v684_v16  ;;  %551 = vst.msk [vmem:[%s1348_s3 + $0x28] sm:$0xf] %vm540_vm0, %v685_v17  ;;  %v102_v29 = vmul.f32 %v765_v1, %v31_v13  ;;  %v103_v30 = vmul.f32 %v765_v1, %v32_v14  ;;  %v104_v31 = vmul.f32 %v765_v1, %v33_v15 }
  0x15   :  { %552 = vst.msk [vmem:[%s1348_s3 + $0x2c] sm:$0xf] %vm540_vm0, %v686_v18  ;;  %v690_v28 = vpack.c.bf16 %v235_v19, %v235_v19  ;;  %553 = vst.msk [vmem:[%s1348_s3 + $0x30] sm:$0xf] %vm540_vm0, %v687_v23  ;;  %v172_v32 = vadd.f32 %v770_v2, %v101_v26  ;;  %v105_v33 = vmul.f32 %v765_v1, %v34_v20  ;;  %v46_v26 = vld [vmem:[%s1345_s0 + $0x100] sm:$0xff] }
  0x16   :  { %554 = vst.msk [vmem:[%s1348_s3 + $0x34] sm:$0xf] %vm540_vm0, %v688_v24  ;;  %555 = vst.msk [vmem:[%s1348_s3 + $0x38] sm:$0xf] %vm540_vm0, %v689_v25  ;;  %v106_v34 = vmul.f32 %v765_v1, %v35_v21  ;;  %v107_v35 = vmul.f32 %v765_v1, %v36_v22  ;;  %v173_v36 = vadd.f32 %v770_v2, %v102_v29 }
  0x17   :  { %556 = vst.msk [vmem:[%s1348_s3 + $0x3c] sm:$0xf] %vm540_vm0, %v690_v28  ;;  %v174_v37 = vadd.f32 %v770_v2, %v103_v30  ;;  %v175_v38 = vadd.f32 %v770_v2, %v104_v31  ;;  %v108_v39 = vmul.f32 %v765_v1, %v37_v27  ;;  %v236_v40 = vmax.f32 %v172_v32, 0.0  ;;  %v47_v31 = vld [vmem:[%s1345_s0 + $0x108] sm:$0xff]  ;;  %v48_v32 = vld [vmem:[%s1345_s0 + $0x110] sm:$0xff] }
  0x18   :  { %v176_v41 = vadd.f32 %v770_v2, %v105_v33  ;;  %v177_v42 = vadd.f32 %v770_v2, %v106_v34  ;;  %v178_v43 = vadd.f32 %v770_v2, %v107_v35  ;;  %v237_v44 = vmax.f32 %v173_v36, 0.0  ;;  %v49_v33 = vld [vmem:[%s1345_s0 + $0x118] sm:$0xff] }
  0x19   :  { %v238_v45 = vmax.f32 %v174_v37, 0.0  ;;  %v239_v46 = vmax.f32 %v175_v38, 0.0  ;;  %v179_v47 = vadd.f32 %v770_v2, %v108_v39  ;;  %v691_v49 = vpack.c.bf16 %v236_v40, %v236_v40  ;;  %v50_v38 = vld [vmem:[%s1345_s0 + $0x120] sm:$0xff]  ;;  %v51_v39 = vld [vmem:[%s1345_s0 + $0x128] sm:$0xff]  ;;  %v52_v40 = vld [vmem:[%s1345_s0 + $0x130] sm:$0xff] }
  0x1a   :  { %v240_v50 = vmax.f32 %v176_v41, 0.0  ;;  %v241_v51 = vmax.f32 %v177_v42, 0.0  ;;  %v242_v52 = vmax.f32 %v178_v43, 0.0  ;;  %v692_v56 = vpack.c.bf16 %v237_v44, %v237_v44 }
  0x1b   :  { %v693_v57 = vpack.c.bf16 %v238_v45, %v238_v45  ;;  %v694_v58 = vpack.c.bf16 %v239_v46, %v239_v46  ;;  %v243_v59 = vmax.f32 %v179_v47, 0.0  ;;  %557 = vst.msk [vmem:[%s1348_s3 + $0x40] sm:$0xf] %vm540_vm0, %v691_v49  ;;  %v109_v4 = vmul.f32 %v765_v1, %v38_v48  ;;  %v53_v45 = vld [vmem:[%s1345_s0 + $0x138] sm:$0xff] }
  0x1c   :  { %v695_v63 = vpack.c.bf16 %v240_v50, %v240_v50  ;;  %v696_v0 = vpack.c.bf16 %v241_v51, %v241_v51  ;;  %v697_v3 = vpack.c.bf16 %v242_v52, %v242_v52  ;;  %558 = vst.msk [vmem:[%s1348_s3 + $0x44] sm:$0xf] %vm540_vm0, %v692_v56  ;;  %v110_v7 = vmul.f32 %v765_v1, %v39_v53 }
  0x1d   :  { %559 = vst.msk [vmem:[%s1348_s3 + $0x48] sm:$0xf] %vm540_vm0, %v693_v57  ;;  %560 = vst.msk [vmem:[%s1348_s3 + $0x4c] sm:$0xf] %vm540_vm0, %v694_v58  ;;  %v698_v6 = vpack.c.bf16 %v243_v59, %v243_v59  ;;  %v111_v8 = vmul.f32 %v765_v1, %v40_v54  ;;  %v112_v9 = vmul.f32 %v765_v1, %v41_v55 }
  0x1e   :  { %561 = vst.msk [vmem:[%s1348_s3 + $0x50] sm:$0xf] %vm540_vm0, %v695_v63  ;;  %562 = vst.msk [vmem:[%s1348_s3 + $0x54] sm:$0xf] %vm540_vm0, %v696_v0  ;;  %v180_v10 = vadd.f32 %v770_v2, %v109_v4  ;;  %v113_v11 = vmul.f32 %v765_v1, %v42_v60  ;;  %v114_v12 = vmul.f32 %v765_v1, %v43_v61  ;;  %v54_v4 = vld [vmem:[%s1345_s0 + $0x140] sm:$0xff] }
  0x1f   :  { %563 = vst.msk [vmem:[%s1348_s3 + $0x58] sm:$0xf] %vm540_vm0, %v697_v3  ;;  %v115_v13 = vmul.f32 %v765_v1, %v44_v62  ;;  %564 = vst.msk [vmem:[%s1348_s3 + $0x5c] sm:$0xf] %vm540_vm0, %v698_v6  ;;  %v181_v14 = vadd.f32 %v770_v2, %v110_v7  ;;  %v182_v15 = vadd.f32 %v770_v2, %v111_v8 }
  0x20   :  { %v183_v16 = vadd.f32 %v770_v2, %v112_v9  ;;  %v116_v17 = vmul.f32 %v765_v1, %v45_v5  ;;  %v244_v18 = vmax.f32 %v180_v10, 0.0  ;;  %v184_v19 = vadd.f32 %v770_v2, %v113_v11  ;;  %v55_v9 = vld [vmem:[%s1345_s0 + $0x148] sm:$0xff]  ;;  %v56_v10 = vld [vmem:[%s1345_s0 + $0x150] sm:$0xff]  ;;  %v57_v11 = vld [vmem:[%s1345_s0 + $0x158] sm:$0xff] }
  0x21   :  { %v185_v20 = vadd.f32 %v770_v2, %v114_v12  ;;  %v186_v21 = vadd.f32 %v770_v2, %v115_v13  ;;  %v245_v22 = vmax.f32 %v181_v14, 0.0  ;;  %v246_v23 = vmax.f32 %v182_v15, 0.0 }
  0x22   :  { %v247_v24 = vmax.f32 %v183_v16, 0.0  ;;  %v187_v25 = vadd.f32 %v770_v2, %v116_v17  ;;  %v699_v27 = vpack.c.bf16 %v244_v18, %v244_v18  ;;  %v248_v28 = vmax.f32 %v184_v19, 0.0  ;;  %v58_v16 = vld [vmem:[%s1345_s0 + $0x160] sm:$0xff]  ;;  %v59_v17 = vld [vmem:[%s1345_s0 + $0x168] sm:$0xff]  ;;  %v60_v18 = vld [vmem:[%s1345_s0 + $0x170] sm:$0xff] }
  0x23   :  { %v249_v29 = vmax.f32 %v185_v20, 0.0  ;;  %v250_v30 = vmax.f32 %v186_v21, 0.0  ;;  %v700_v34 = vpack.c.bf16 %v245_v22, %v245_v22  ;;  %v701_v35 = vpack.c.bf16 %v246_v23, %v246_v23  ;;  %v61_v23 = vld [vmem:[%s1345_s0 + $0x178] sm:$0xff] }
  0x24   :  { %v702_v36 = vpack.c.bf16 %v247_v24, %v247_v24  ;;  %v251_v37 = vmax.f32 %v187_v25, 0.0  ;;  %565 = vst.msk [vmem:[%s1348_s3 + $0x60] sm:$0xf] %vm540_vm0, %v699_v27  ;;  %v703_v41 = vpack.c.bf16 %v248_v28, %v248_v28  ;;  %v117_v44 = vmul.f32 %v765_v1, %v46_v26 }
  0x25   :  { %v704_v42 = vpack.c.bf16 %v249_v29, %v249_v29  ;;  %v705_v43 = vpack.c.bf16 %v250_v30, %v250_v30  ;;  %566 = vst.msk [vmem:[%s1348_s3 + $0x64] sm:$0xf] %vm540_vm0, %v700_v34  ;;  %567 = vst.msk [vmem:[%s1348_s3 + $0x68] sm:$0xf] %vm540_vm0, %v701_v35  ;;  %v118_v47 = vmul.f32 %v765_v1, %v47_v31 }
  0x26   :  { %568 = vst.msk [vmem:[%s1348_s3 + $0x6c] sm:$0xf] %vm540_vm0, %v702_v36  ;;  %v706_v46 = vpack.c.bf16 %v251_v37, %v251_v37  ;;  %v119_v48 = vmul.f32 %v765_v1, %v48_v32  ;;  %v120_v49 = vmul.f32 %v765_v1, %v49_v33  ;;  %569 = vst.msk [vmem:[%s1348_s3 + $0x70] sm:$0xf] %vm540_vm0, %v703_v41 }
  0x27   :  { %570 = vst.msk [vmem:[%s1348_s3 + $0x74] sm:$0xf] %vm540_vm0, %v704_v42  ;;  %571 = vst.msk [vmem:[%s1348_s3 + $0x78] sm:$0xf] %vm540_vm0, %v705_v43  ;;  %v188_v50 = vadd.f32 %v770_v2, %v117_v44  ;;  %v121_v51 = vmul.f32 %v765_v1, %v50_v38  ;;  %v122_v52 = vmul.f32 %v765_v1, %v51_v39  ;;  %v62_v44 = vld [vmem:[%s1345_s0 + $0x180] sm:$0xff] }
  0x28   :  { %v123_v53 = vmul.f32 %v765_v1, %v52_v40  ;;  %572 = vst.msk [vmem:[%s1348_s3 + $0x7c] sm:$0xf] %vm540_vm0, %v706_v46  ;;  %v189_v54 = vadd.f32 %v770_v2, %v118_v47  ;;  %v190_v55 = vadd.f32 %v770_v2, %v119_v48  ;;  %v191_v56 = vadd.f32 %v770_v2, %v120_v49  ;;  %v63_v49 = vld [vmem:[%s1345_s0 + $0x188] sm:$0xff] }
  0x29   :  { %v124_v57 = vmul.f32 %v765_v1, %v53_v45  ;;  %v252_v58 = vmax.f32 %v188_v50, 0.0  ;;  %v192_v59 = vadd.f32 %v770_v2, %v121_v51  ;;  %v193_v60 = vadd.f32 %v770_v2, %v122_v52  ;;  %v64_v50 = vld [vmem:[%s1345_s0 + $0x190] sm:$0xff]  ;;  %v65_v51 = vld [vmem:[%s1345_s0 + $0x198] sm:$0xff] }
  0x2a   :  { %v194_v61 = vadd.f32 %v770_v2, %v123_v53  ;;  %v253_v62 = vmax.f32 %v189_v54, 0.0  ;;  %v254_v63 = vmax.f32 %v190_v55, 0.0  ;;  %v255_v0 = vmax.f32 %v191_v56, 0.0  ;;  %v66_v56 = vld [vmem:[%s1345_s0 + $0x1a0] sm:$0xff] }
  0x2b   :  { %v195_v3 = vadd.f32 %v770_v2, %v124_v57  ;;  %v707_v5 = vpack.c.bf16 %v252_v58, %v252_v58  ;;  %v256_v6 = vmax.f32 %v192_v59, 0.0  ;;  %v257_v7 = vmax.f32 %v193_v60, 0.0  ;;  %v67_v57 = vld [vmem:[%s1345_s0 + $0x1a8] sm:$0xff]  ;;  %v68_v58 = vld [vmem:[%s1345_s0 + $0x1b0] sm:$0xff] }
  0x2c   :  { %v258_v8 = vmax.f32 %v194_v61, 0.0  ;;  %v708_v12 = vpack.c.bf16 %v253_v62, %v253_v62  ;;  %v709_v13 = vpack.c.bf16 %v254_v63, %v254_v63  ;;  %v710_v14 = vpack.c.bf16 %v255_v0, %v255_v0  ;;  %v69_v63 = vld [vmem:[%s1345_s0 + $0x1b8] sm:$0xff] }
  0x2d   :  { %v259_v15 = vmax.f32 %v195_v3, 0.0  ;;  %573 = vst.msk [vmem:[%s1348_s3 + $0x80] sm:$0xf] %vm540_vm0, %v707_v5  ;;  %v711_v19 = vpack.c.bf16 %v256_v6, %v256_v6  ;;  %v712_v20 = vpack.c.bf16 %v257_v7, %v257_v7  ;;  %v125_v22 = vmul.f32 %v765_v1, %v54_v4 }
  0x2e   :  { %v713_v21 = vpack.c.bf16 %v258_v8, %v258_v8  ;;  %574 = vst.msk [vmem:[%s1348_s3 + $0x84] sm:$0xf] %vm540_vm0, %v708_v12  ;;  %575 = vst.msk [vmem:[%s1348_s3 + $0x88] sm:$0xf] %vm540_vm0, %v709_v13  ;;  %v126_v25 = vmul.f32 %v765_v1, %v55_v9  ;;  %v127_v26 = vmul.f32 %v765_v1, %v56_v10 }
  0x2f   :  { %576 = vst.msk [vmem:[%s1348_s3 + $0x8c] sm:$0xf] %vm540_vm0, %v710_v14  ;;  %v714_v24 = vpack.c.bf16 %v259_v15, %v259_v15  ;;  %v128_v27 = vmul.f32 %v765_v1, %v57_v11  ;;  %577 = vst.msk [vmem:[%s1348_s3 + $0x90] sm:$0xf] %vm540_vm0, %v711_v19  ;;  %v196_v28 = vadd.f32 %v770_v2, %v125_v22  ;;  %v70_v22 = vld [vmem:[%s1345_s0 + $0x1c0] sm:$0xff] }
  0x30   :  { %578 = vst.msk [vmem:[%s1348_s3 + $0x94] sm:$0xf] %vm540_vm0, %v712_v20  ;;  %579 = vst.msk [vmem:[%s1348_s3 + $0x98] sm:$0xf] %vm540_vm0, %v713_v21  ;;  %v129_v29 = vmul.f32 %v765_v1, %v58_v16  ;;  %v130_v30 = vmul.f32 %v765_v1, %v59_v17  ;;  %v131_v31 = vmul.f32 %v765_v1, %v60_v18 }
  0x31   :  { %580 = vst.msk [vmem:[%s1348_s3 + $0x9c] sm:$0xf] %vm540_vm0, %v714_v24  ;;  %v197_v32 = vadd.f32 %v770_v2, %v126_v25  ;;  %v198_v33 = vadd.f32 %v770_v2, %v127_v26  ;;  %v199_v34 = vadd.f32 %v770_v2, %v128_v27  ;;  %v132_v35 = vmul.f32 %v765_v1, %v61_v23  ;;  %v71_v27 = vld [vmem:[%s1345_s0 + $0x1c8] sm:$0xff] }
  0x32   :  { %v260_v36 = vmax.f32 %v196_v28, 0.0  ;;  %v200_v37 = vadd.f32 %v770_v2, %v129_v29  ;;  %v201_v38 = vadd.f32 %v770_v2, %v130_v30  ;;  %v202_v39 = vadd.f32 %v770_v2, %v131_v31  ;;  %v72_v28 = vld [vmem:[%s1345_s0 + $0x1d0] sm:$0xff]  ;;  %v73_v29 = vld [vmem:[%s1345_s0 + $0x1d8] sm:$0xff] }
  0x33   :  { %v261_v40 = vmax.f32 %v197_v32, 0.0  ;;  %v262_v41 = vmax.f32 %v198_v33, 0.0  ;;  %v263_v42 = vmax.f32 %v199_v34, 0.0  ;;  %v203_v43 = vadd.f32 %v770_v2, %v132_v35  ;;  %v74_v34 = vld [vmem:[%s1345_s0 + $0x1e0] sm:$0xff]  ;;  %v75_v35 = vld [vmem:[%s1345_s0 + $0x1e8] sm:$0xff] }
  0x34   :  { %v715_v45 = vpack.c.bf16 %v260_v36, %v260_v36  ;;  %v264_v46 = vmax.f32 %v200_v37, 0.0  ;;  %v265_v47 = vmax.f32 %v201_v38, 0.0  ;;  %v266_v48 = vmax.f32 %v202_v39, 0.0  ;;  %v76_v36 = vld [vmem:[%s1345_s0 + $0x1f0] sm:$0xff] }
  0x35   :  { %v716_v52 = vpack.c.bf16 %v261_v40, %v261_v40  ;;  %v717_v53 = vpack.c.bf16 %v262_v41, %v262_v41  ;;  %v718_v54 = vpack.c.bf16 %v263_v42, %v263_v42  ;;  %v267_v55 = vmax.f32 %v203_v43, 0.0  ;;  %v77_v41 = vld [vmem:[%s1345_s0 + $0x1f8] sm:$0xff] }
  0x36   :  { %581 = vst.msk [vmem:[%s1348_s3 + $0xa0] sm:$0xf] %vm540_vm0, %v715_v45  ;;  %v719_v59 = vpack.c.bf16 %v264_v46, %v264_v46  ;;  %v720_v60 = vpack.c.bf16 %v265_v47, %v265_v47  ;;  %v721_v61 = vpack.c.bf16 %v266_v48, %v266_v48  ;;  %v133_v62 = vmul.f32 %v765_v1, %v62_v44 }
  0x37   :  { %582 = vst.msk [vmem:[%s1348_s3 + $0xa4] sm:$0xf] %vm540_vm0, %v716_v52  ;;  %583 = vst.msk [vmem:[%s1348_s3 + $0xa8] sm:$0xf] %vm540_vm0, %v717_v53  ;;  %v722_v0 = vpack.c.bf16 %v267_v55, %v267_v55  ;;  %v134_v3 = vmul.f32 %v765_v1, %v63_v49  ;;  %v135_v4 = vmul.f32 %v765_v1, %v64_v50 }
  0x38   :  { %584 = vst.msk [vmem:[%s1348_s3 + $0xac] sm:$0xf] %vm540_vm0, %v718_v54  ;;  %v136_v5 = vmul.f32 %v765_v1, %v65_v51  ;;  %585 = vst.msk [vmem:[%s1348_s3 + $0xb0] sm:$0xf] %vm540_vm0, %v719_v59  ;;  %v204_v6 = vadd.f32 %v770_v2, %v133_v62  ;;  %v137_v7 = vmul.f32 %v765_v1, %v66_v56 }
  0x39   :  { %586 = vst.msk [vmem:[%s1348_s3 + $0xb4] sm:$0xf] %vm540_vm0, %v720_v60  ;;  %587 = vst.msk [vmem:[%s1348_s3 + $0xb8] sm:$0xf] %vm540_vm0, %v721_v61  ;;  %v138_v8 = vmul.f32 %v765_v1, %v67_v57  ;;  %v139_v9 = vmul.f32 %v765_v1, %v68_v58  ;;  %v205_v10 = vadd.f32 %v770_v2, %v134_v3 }
  0x3a   :  { %588 = vst.msk [vmem:[%s1348_s3 + $0xbc] sm:$0xf] %vm540_vm0, %v722_v0  ;;  %v206_v11 = vadd.f32 %v770_v2, %v135_v4  ;;  %v207_v12 = vadd.f32 %v770_v2, %v136_v5  ;;  %v140_v13 = vmul.f32 %v765_v1, %v69_v63  ;;  %v268_v14 = vmax.f32 %v204_v6, 0.0 }
  0x3b   :  { %v208_v15 = vadd.f32 %v770_v2, %v137_v7  ;;  %v209_v16 = vadd.f32 %v770_v2, %v138_v8  ;;  %v210_v17 = vadd.f32 %v770_v2, %v139_v9  ;;  %v269_v18 = vmax.f32 %v205_v10, 0.0 }
  0x3c   :  { %v270_v19 = vmax.f32 %v206_v11, 0.0  ;;  %v271_v20 = vmax.f32 %v207_v12, 0.0  ;;  %v211_v21 = vadd.f32 %v770_v2, %v140_v13  ;;  %v723_v23 = vpack.c.bf16 %v268_v14, %v268_v14 }
  0x3d   :  { %v272_v24 = vmax.f32 %v208_v15, 0.0  ;;  %v273_v25 = vmax.f32 %v209_v16, 0.0  ;;  %v274_v26 = vmax.f32 %v210_v17, 0.0  ;;  %v724_v30 = vpack.c.bf16 %v269_v18, %v269_v18 }
  0x3e   :  { %v725_v31 = vpack.c.bf16 %v270_v19, %v270_v19  ;;  %v726_v32 = vpack.c.bf16 %v271_v20, %v271_v20  ;;  %v275_v33 = vmax.f32 %v211_v21, 0.0  ;;  %589 = vst.msk [vmem:[%s1348_s3 + $0xc0] sm:$0xf] %vm540_vm0, %v723_v23  ;;  %v141_v40 = vmul.f32 %v765_v1, %v70_v22 }
  0x3f   :  { %v727_v37 = vpack.c.bf16 %v272_v24, %v272_v24  ;;  %v728_v38 = vpack.c.bf16 %v273_v25, %v273_v25  ;;  %v729_v39 = vpack.c.bf16 %v274_v26, %v274_v26  ;;  %590 = vst.msk [vmem:[%s1348_s3 + $0xc4] sm:$0xf] %vm540_vm0, %v724_v30  ;;  %v142_v43 = vmul.f32 %v765_v1, %v71_v27 }
  0x40   :  { %591 = vst.msk [vmem:[%s1348_s3 + $0xc8] sm:$0xf] %vm540_vm0, %v725_v31  ;;  %592 = vst.msk [vmem:[%s1348_s3 + $0xcc] sm:$0xf] %vm540_vm0, %v726_v32  ;;  %v730_v42 = vpack.c.bf16 %v275_v33, %v275_v33  ;;  %v143_v44 = vmul.f32 %v765_v1, %v72_v28  ;;  %v144_v45 = vmul.f32 %v765_v1, %v73_v29 }
  0x41   :  { %593 = vst.msk [vmem:[%s1348_s3 + $0xd0] sm:$0xf] %vm540_vm0, %v727_v37  ;;  %594 = vst.msk [vmem:[%s1348_s3 + $0xd4] sm:$0xf] %vm540_vm0, %v728_v38  ;;  %v212_v46 = vadd.f32 %v770_v2, %v141_v40  ;;  %v145_v47 = vmul.f32 %v765_v1, %v74_v34  ;;  %v146_v48 = vmul.f32 %v765_v1, %v75_v35 }
  0x42   :  { %595 = vst.msk [vmem:[%s1348_s3 + $0xd8] sm:$0xf] %vm540_vm0, %v729_v39  ;;  %v147_v49 = vmul.f32 %v765_v1, %v76_v36  ;;  %596 = vst.msk [vmem:[%s1348_s3 + $0xdc] sm:$0xf] %vm540_vm0, %v730_v42  ;;  %v213_v50 = vadd.f32 %v770_v2, %v142_v43  ;;  %v214_v51 = vadd.f32 %v770_v2, %v143_v44 }
  0x43   :  { %v215_v52 = vadd.f32 %v770_v2, %v144_v45  ;;  %v148_v53 = vmul.f32 %v765_v1, %v77_v41  ;;  %v276_v54 = vmax.f32 %v212_v46, 0.0  ;;  %v216_v55 = vadd.f32 %v770_v2, %v145_v47 }
  0x44   :  { %v217_v56 = vadd.f32 %v770_v2, %v146_v48  ;;  %v218_v57 = vadd.f32 %v770_v2, %v147_v49  ;;  %v277_v58 = vmax.f32 %v213_v50, 0.0  ;;  %v278_v59 = vmax.f32 %v214_v51, 0.0 }
  0x45   :  { %v279_v60 = vmax.f32 %v215_v52, 0.0  ;;  %v219_v61 = vadd.f32 %v770_v2, %v148_v53  ;;  %v731_v62 = vpack.c.bf16 %v276_v54, %v276_v54  ;;  %v280_v63 = vmax.f32 %v216_v55, 0.0 }
  0x46   :  { %v281_v0 = vmax.f32 %v217_v56, 0.0  ;;  %v282_v3 = vmax.f32 %v218_v57, 0.0  ;;  %v732_v4 = vpack.c.bf16 %v277_v58, %v277_v58  ;;  %v733_v5 = vpack.c.bf16 %v278_v59, %v278_v59 }
  0x47   :  { %v734_v6 = vpack.c.bf16 %v279_v60, %v279_v60  ;;  %v283_v1 = vmax.f32 %v219_v61, 0.0  ;;  %597 = vst.msk [vmem:[%s1348_s3 + $0xe0] sm:$0xf] %vm540_vm0, %v731_v62  ;;  %v735_v7 = vpack.c.bf16 %v280_v63, %v280_v63 }
  0x48   :  { %v736_v8 = vpack.c.bf16 %v281_v0, %v281_v0  ;;  %v737_v9 = vpack.c.bf16 %v282_v3, %v282_v3  ;;  %598 = vst.msk [vmem:[%s1348_s3 + $0xe4] sm:$0xf] %vm540_vm0, %v732_v4  ;;  %599 = vst.msk [vmem:[%s1348_s3 + $0xe8] sm:$0xf] %vm540_vm0, %v733_v5 }
  0x49   :  { %600 = vst.msk [vmem:[%s1348_s3 + $0xec] sm:$0xf] %vm540_vm0, %v734_v6  ;;  %v738_v2 = vpack.c.bf16 %v283_v1, %v283_v1  ;;  %601 = vst.msk [vmem:[%s1348_s3 + $0xf0] sm:$0xf] %vm540_vm0, %v735_v7 }
  0x4a   :  { %602 = vst.msk [vmem:[%s1348_s3 + $0xf4] sm:$0xf] %vm540_vm0, %v736_v8  ;;  %603 = vst.msk [vmem:[%s1348_s3 + $0xf8] sm:$0xf] %vm540_vm0, %v737_v9 }
  0x4b   :  { %604 = vst.msk [vmem:[%s1348_s3 + $0xfc] sm:$0xf] %vm540_vm0, %v738_v2 }

// kernel: densenet_forward.13
= control target key start
LH: loop header
LB: loop body
LE: loop exit
PB: predicated region body
PF: predicated region fallthrough
CT: control target
= control target key end

     0   :  { %v44_v0 = vlaneseq  ;;  %vm160_vm0 = vcmask 130048   ;;  %v513_v38 = vmov 0   ;;  %vm408_vm1 = vcmask 125952   ;;  %s756_s1 = inlined_call_operand.vmem [shape: bf16[16,16], index: 1, kind: input, shape index: {}]   ;;  %s757_s2 = inlined_call_operand.vmem [shape: bf16[1,16], index: 2, kind: input, shape index: {}]   ;;  %s758_s3 = inlined_call_operand.vmem [shape: bf16[1,16], index: 3, kind: input, shape index: {}]   ;;  %s759_s0 = inlined_call_operand.vmem [shape: bf16[128,16], index: 0, kind: input, shape index: {}]   ;;  %s760_s4 = inlined_call_operand.vmem [shape: f32[1,16], index: 4, kind: input, shape index: {}]   ;;  %s761_s5 = inlined_call_operand.vmem [shape: f32[1,16], index: 5, kind: input, shape index: {}]   ;;  %s762_s6 = inlined_call_operand.vmem [shape: bf16[128,16], index: 6, kind: output, shape index: {}]  }
   0x1   :  { %v512_v1 = vld [vmem:[%s756_s1] sm:$0xff]   ;;  %v26_v14 = vld [vmem:[%s759_s0 + $0x8] sm:$0xf]  ;;  %v27_v17 = vld [vmem:[%s759_s0 + $0xc] sm:$0xf] }
   0x2   :  { %v40_v2 = vld [vmem:[%s757_s2] sm:$0x1]  ;;  %491 = vmatprep.subr.bf16.mxu0 %v512_v1  ;;  %509 = vmatprep.subr.bf16.mxu1 %v512_v1  ;;  %v45_v4 = vshrl.u32 %v44_v0, 7  ;;  %v25_v9 = vld [vmem:[%s759_s0 + $0x4] sm:$0xf] }
   0x3   :  { %v42_v3 = vpack.i.b16 %v40_v2, %v40_v2  ;;  %v68_v5 = vld [vmem:[%s758_s3] sm:$0x1]  ;;  %492 = vmatpush3.bf16.msra.mxu0 %v512_v1  ;;  %510 = vmatpush3.bf16.msra.mxu1 %v512_v1  ;;  %v33_v13 = vld [vmem:[%s759_s0 + $0x24] sm:$0xf]  ;;  %v34_v18 = vld [vmem:[%s759_s0 + $0x28] sm:$0xf] }
   0x4   :  { %v70_v6 = vpack.i.b16 %v68_v5, %v68_v5  ;;  %v46_v7 = vsub.s32 0, %v45_v4  ;;  %v24_v8 = vld [vmem:[%s759_s0] sm:$0xf]  ;;  %v35_v19 = vld [vmem:[%s759_s0 + $0x2c] sm:$0xf] }
   0x5   :  { %v32_v12 = vld [vmem:[%s759_s0 + $0x20] sm:$0xf]  ;;  %v28_v36 = vld [vmem:[%s759_s0 + $0x10] sm:$0xf]  ;;  %v29_v37 = vld [vmem:[%s759_s0 + $0x14] sm:$0xf] }
   0x6   :  { %v47_v10 = vrot.slane %v42_v3, %v46_v7  ;;  %v75_v11 = vrot.slane %v70_v6, %v46_v7  ;;  %v36_v43 = vld [vmem:[%s759_s0 + $0x30] sm:$0xf]  ;;  %v37_v44 = vld [vmem:[%s759_s0 + $0x34] sm:$0xf]  ;;  %v30_v49 = vld [vmem:[%s759_s0 + $0x18] sm:$0xf] }
   0x7   :  { %v31_v54 = vld [vmem:[%s759_s0 + $0x1c] sm:$0xf]  ;;  %v38_v59 = vld [vmem:[%s759_s0 + $0x38] sm:$0xf] }
   0x8   :  { %v573_v15 = vcombine.low %v47_v10, %v47_v10  ;;  %v575_v16 = vcombine.low %v75_v11, %v75_v11  ;;  %v39_v63 = vld [vmem:[%s759_s0 + $0x3c] sm:$0xf] }
   0xa   :  { %v52_v20 = vmul.bf16 %v573_v15, %v24_v8  ;;  %v53_v21 = vmul.bf16 %v573_v15, %v25_v9  ;;  %v60_v22 = vmul.bf16 %v573_v15, %v32_v12  ;;  %v61_v23 = vmul.bf16 %v573_v15, %v33_v13 }
   0xb   :  { %v54_v24 = vmul.bf16 %v573_v15, %v26_v14  ;;  %v55_v25 = vmul.bf16 %v573_v15, %v27_v17  ;;  %v62_v26 = vmul.bf16 %v573_v15, %v34_v18  ;;  %v63_v27 = vmul.bf16 %v573_v15, %v35_v19 }
   0xc   :  { %v80_v28 = vadd.bf16 %v575_v16, %v52_v20  ;;  %v81_v29 = vadd.bf16 %v575_v16, %v53_v21  ;;  %v88_v30 = vadd.bf16 %v575_v16, %v60_v22  ;;  %v89_v31 = vadd.bf16 %v575_v16, %v61_v23 }
   0xd   :  { %v82_v32 = vadd.bf16 %v575_v16, %v54_v24  ;;  %v83_v33 = vadd.bf16 %v575_v16, %v55_v25  ;;  %v90_v34 = vadd.bf16 %v575_v16, %v62_v26  ;;  %v91_v35 = vadd.bf16 %v575_v16, %v63_v27 }
   0xe   :  { %v96_v39 = vmax.bf16 %v513_v38, %v80_v28  ;;  %v97_v40 = vmax.bf16 %v513_v38, %v81_v29  ;;  %v104_v41 = vmax.bf16 %v513_v38, %v88_v30  ;;  %v105_v42 = vmax.bf16 %v513_v38, %v89_v31 }
   0xf   :  { %v98_v45 = vmax.bf16 %v513_v38, %v82_v32  ;;  %v99_v46 = vmax.bf16 %v513_v38, %v83_v33  ;;  %v106_v47 = vmax.bf16 %v513_v38, %v90_v34  ;;  %v107_v48 = vmax.bf16 %v513_v38, %v91_v35 }
  0x10   :  { %v431_v50 = vcombine.low %v96_v39, %v97_v40  ;;  %v435_v51 = vcombine.low %v104_v41, %v105_v42  ;;  %v56_v52 = vmul.bf16 %v573_v15, %v28_v36  ;;  %v57_v53 = vmul.bf16 %v573_v15, %v29_v37 }
  0x11   :  { %v432_v55 = vcombine.low %v98_v45, %v99_v46  ;;  %v436_v56 = vcombine.low %v106_v47, %v107_v48  ;;  %v64_v57 = vmul.bf16 %v573_v15, %v36_v43  ;;  %v65_v58 = vmul.bf16 %v573_v15, %v37_v44 }
  0x12   :  { %493 = vmatprep.mubr.msk.bf16.mxu0 %vm160_vm0, %v431_v50  ;;  %501 = vmatprep.mubr.msk.bf16.mxu1 %vm160_vm0, %v435_v51  ;;  %v84_v60 = vadd.bf16 %v575_v16, %v56_v52  ;;  %v85_v61 = vadd.bf16 %v575_v16, %v57_v53  ;;  %v58_v62 = vmul.bf16 %v573_v15, %v30_v49 }
  0x13   :  { %494 = vmatmul.mubr.msk.bf16.vlgmr.msra.gmra.mxu0 %vm160_vm0, %v432_v55  ;;  %502 = vmatmul.mubr.msk.bf16.vlgmr.msra.gmra.mxu1 %vm160_vm0, %v436_v56  ;;  %v92_v0 = vadd.bf16 %v575_v16, %v64_v57  ;;  %v93_v1 = vadd.bf16 %v575_v16, %v65_v58  ;;  %v59_v2 = vmul.bf16 %v573_v15, %v31_v54 }
  0x14   :  { %v100_v3 = vmax.bf16 %v513_v38, %v84_v60  ;;  %v101_v4 = vmax.bf16 %v513_v38, %v85_v61  ;;  %v86_v5 = vadd.bf16 %v575_v16, %v58_v62  ;;  %v66_v6 = vmul.bf16 %v573_v15, %v38_v59 }
  0x15   :  { %v108_v7 = vmax.bf16 %v513_v38, %v92_v0  ;;  %v109_v8 = vmax.bf16 %v513_v38, %v93_v1  ;;  %v87_v9 = vadd.bf16 %v575_v16, %v59_v2  ;;  %v67_v10 = vmul.bf16 %v573_v15, %v39_v63  ;;  %v653_v15 = vld [vmem:[%s760_s4] ss:$0 sm:$0xff] }
  0x16   :  { %v433_v11 = vcombine.low %v100_v3, %v101_v4  ;;  %v102_v12 = vmax.bf16 %v513_v38, %v86_v5  ;;  %v94_v13 = vadd.bf16 %v575_v16, %v66_v6 }
  0x17   :  { %v437_v14 = vcombine.low %v108_v7, %v109_v8  ;;  %v103_v17 = vmax.bf16 %v513_v38, %v87_v9  ;;  %v95_v18 = vadd.bf16 %v575_v16, %v67_v10  ;;  %v658_v16 = vld [vmem:[%s761_s5] ss:$0 sm:$0xff] }
  0x18   :  { %497 = vmatprep.mubr.msk.bf16.mxu0 %vm160_vm0, %v433_v11  ;;  %v110_v19 = vmax.bf16 %v513_v38, %v94_v13 }
  0x19   :  { %505 = vmatprep.mubr.msk.bf16.mxu1 %vm160_vm0, %v437_v14  ;;  %v434_v20 = vcombine.low %v102_v12, %v103_v17  ;;  %v111_v21 = vmax.bf16 %v513_v38, %v95_v18 }
  0x1b   :  { %498 = vmatmul.mubr.msk.bf16.gmra.mxu0 %vm160_vm0, %v434_v20  ;;  %v438_v22 = vcombine.low %v110_v19, %v111_v21 }
  0x1d   :  { %506 = vmatmul.mubr.msk.bf16.gmra.mxu1 %vm160_vm0, %v438_v22 }
  0xd3   :  { %v495_v23 = vpop.f32.mrf.mxu0  ;;  %v503_v24 = vpop.f32.mrf.mxu1 }
  0xd4   :  { %v291_v25 = vmul.f32 %v495_v23, %v653_v15  ;;  %v299_v26 = vmul.f32 %v503_v24, %v653_v15 }
  0xd5   :  { %v219_v27 = vpop.f32.mrf.mxu0  ;;  %v251_v28 = vpop.f32.mrf.mxu1 }
  0xd6   :  { %v314_v29 = vadd.f32 %v658_v16, %v291_v25  ;;  %v322_v30 = vadd.f32 %v658_v16, %v299_v26  ;;  %v289_v31 = vmul.f32 %v653_v15, %v219_v27  ;;  %v297_v32 = vmul.f32 %v653_v15, %v251_v28 }
  0xd7   :  { %v496_v33 = vpop.f32.mrf.mxu0  ;;  %v504_v34 = vpop.f32.mrf.mxu1 }
  0xd8   :  { %v330_v35 = vmax.f32 %v314_v29, 0.0  ;;  %v338_v36 = vmax.f32 %v322_v30, 0.0  ;;  %v312_v37 = vadd.f32 %v658_v16, %v289_v31  ;;  %v320_v38 = vadd.f32 %v658_v16, %v297_v32 }
  0xd9   :  { %v292_v39 = vmul.f32 %v496_v33, %v653_v15  ;;  %v300_v40 = vmul.f32 %v504_v34, %v653_v15  ;;  %v222_v41 = vpop.f32.mrf.mxu0  ;;  %v254_v42 = vpop.f32.mrf.mxu1 }
  0xda   :  { %v468_v43 = vpack.c.bf16 %v330_v35, %v330_v35  ;;  %v476_v44 = vpack.c.bf16 %v338_v36, %v338_v36  ;;  %v328_v45 = vmax.f32 %v312_v37, 0.0  ;;  %v336_v46 = vmax.f32 %v320_v38, 0.0 }
  0xdb   :  { %v315_v47 = vadd.f32 %v658_v16, %v292_v39  ;;  %v323_v48 = vadd.f32 %v658_v16, %v300_v40  ;;  %v290_v49 = vmul.f32 %v653_v15, %v222_v41  ;;  %v298_v50 = vmul.f32 %v653_v15, %v254_v42  ;;  %v499_v51 = vpop.f32.mrf.mxu0 }
  0xdc   :  { %411 = vst.msk [vmem:[%s762_s6 + $0x8] sm:$0xf] %vm408_vm1, %v468_v43  ;;  %419 = vst.msk [vmem:[%s762_s6 + $0x28] sm:$0xf] %vm408_vm1, %v476_v44  ;;  %v466_v52 = vpack.c.bf16 %v328_v45, %v328_v45  ;;  %v474_v53 = vpack.c.bf16 %v336_v46, %v336_v46  ;;  %v295_v54 = vmul.f32 %v499_v51, %v653_v15 }
  0xdd   :  { %v331_v55 = vmax.f32 %v315_v47, 0.0  ;;  %v339_v56 = vmax.f32 %v323_v48, 0.0  ;;  %v313_v57 = vadd.f32 %v658_v16, %v290_v49  ;;  %v321_v58 = vadd.f32 %v658_v16, %v298_v50  ;;  %v507_v59 = vpop.f32.mrf.mxu1  ;;  %v235_v60 = vpop.f32.mrf.mxu0 }
  0xde   :  { %409 = vst.msk [vmem:[%s762_s6] sm:$0xf] %vm408_vm1, %v466_v52  ;;  %417 = vst.msk [vmem:[%s762_s6 + $0x20] sm:$0xf] %vm408_vm1, %v474_v53  ;;  %v318_v61 = vadd.f32 %v658_v16, %v295_v54  ;;  %v303_v62 = vmul.f32 %v507_v59, %v653_v15  ;;  %v293_v63 = vmul.f32 %v653_v15, %v235_v60 }
  0xdf   :  { %v469_v0 = vpack.c.bf16 %v331_v55, %v331_v55  ;;  %v477_v1 = vpack.c.bf16 %v339_v56, %v339_v56  ;;  %v329_v2 = vmax.f32 %v313_v57, 0.0  ;;  %v337_v3 = vmax.f32 %v321_v58, 0.0  ;;  %v267_v4 = vpop.f32.mrf.mxu1  ;;  %v500_v5 = vpop.f32.mrf.mxu0 }
  0xe0   :  { %v334_v6 = vmax.f32 %v318_v61, 0.0  ;;  %v326_v7 = vadd.f32 %v658_v16, %v303_v62  ;;  %v316_v8 = vadd.f32 %v658_v16, %v293_v63  ;;  %v301_v9 = vmul.f32 %v653_v15, %v267_v4 }
  0xe1   :  { %412 = vst.msk [vmem:[%s762_s6 + $0xc] sm:$0xf] %vm408_vm1, %v469_v0  ;;  %420 = vst.msk [vmem:[%s762_s6 + $0x2c] sm:$0xf] %vm408_vm1, %v477_v1  ;;  %v467_v10 = vpack.c.bf16 %v329_v2, %v329_v2  ;;  %v475_v11 = vpack.c.bf16 %v337_v3, %v337_v3  ;;  %v296_v12 = vmul.f32 %v500_v5, %v653_v15  ;;  %v508_v13 = vpop.f32.mrf.mxu1  ;;  %v238_v14 = vpop.f32.mrf.mxu0 }
  0xe2   :  { %v472_v17 = vpack.c.bf16 %v334_v6, %v334_v6  ;;  %v342_v18 = vmax.f32 %v326_v7, 0.0  ;;  %v332_v19 = vmax.f32 %v316_v8, 0.0  ;;  %v324_v20 = vadd.f32 %v658_v16, %v301_v9 }
  0xe3   :  { %410 = vst.msk [vmem:[%s762_s6 + $0x4] sm:$0xf] %vm408_vm1, %v467_v10  ;;  %418 = vst.msk [vmem:[%s762_s6 + $0x24] sm:$0xf] %vm408_vm1, %v475_v11  ;;  %v319_v21 = vadd.f32 %v658_v16, %v296_v12  ;;  %v304_v22 = vmul.f32 %v508_v13, %v653_v15  ;;  %v294_v23 = vmul.f32 %v653_v15, %v238_v14  ;;  %v270_v24 = vpop.f32.mrf.mxu1 }
  0xe4   :  { %415 = vst.msk [vmem:[%s762_s6 + $0x18] sm:$0xf] %vm408_vm1, %v472_v17  ;;  %v480_v25 = vpack.c.bf16 %v342_v18, %v342_v18  ;;  %v470_v26 = vpack.c.bf16 %v332_v19, %v332_v19  ;;  %v340_v27 = vmax.f32 %v324_v20, 0.0  ;;  %v302_v28 = vmul.f32 %v653_v15, %v270_v24 }
  0xe5   :  { %v335_v29 = vmax.f32 %v319_v21, 0.0  ;;  %v327_v30 = vadd.f32 %v658_v16, %v304_v22  ;;  %v317_v31 = vadd.f32 %v658_v16, %v294_v23 }
  0xe6   :  { %423 = vst.msk [vmem:[%s762_s6 + $0x38] sm:$0xf] %vm408_vm1, %v480_v25  ;;  %413 = vst.msk [vmem:[%s762_s6 + $0x10] sm:$0xf] %vm408_vm1, %v470_v26  ;;  %v478_v32 = vpack.c.bf16 %v340_v27, %v340_v27  ;;  %v325_v33 = vadd.f32 %v658_v16, %v302_v28 }
  0xe7   :  { %v473_v34 = vpack.c.bf16 %v335_v29, %v335_v29  ;;  %v343_v15 = vmax.f32 %v327_v30, 0.0  ;;  %v333_v35 = vmax.f32 %v317_v31, 0.0 }
  0xe8   :  { %421 = vst.msk [vmem:[%s762_s6 + $0x30] sm:$0xf] %vm408_vm1, %v478_v32  ;;  %v341_v36 = vmax.f32 %v325_v33, 0.0 }
  0xe9   :  { %416 = vst.msk [vmem:[%s762_s6 + $0x1c] sm:$0xf] %vm408_vm1, %v473_v34  ;;  %v481_v37 = vpack.c.bf16 %v343_v15, %v343_v15  ;;  %v471_v38 = vpack.c.bf16 %v333_v35, %v333_v35 }
  0xea   :  { %v479_v39 = vpack.c.bf16 %v341_v36, %v341_v36 }
  0xeb   :  { %424 = vst.msk [vmem:[%s762_s6 + $0x3c] sm:$0xf] %vm408_vm1, %v481_v37  ;;  %414 = vst.msk [vmem:[%s762_s6 + $0x14] sm:$0xf] %vm408_vm1, %v471_v38 }
  0xec   :  { %422 = vst.msk [vmem:[%s762_s6 + $0x34] sm:$0xf] %vm408_vm1, %v479_v39 }

// kernel: densenet_forward.14
= control target key start
LH: loop header
LB: loop body
LE: loop exit
PB: predicated region body
PF: predicated region fallthrough
CT: control target
= control target key end

     0   :  { %vm76_vm0 = vcmask 130048   ;;  %vm262_vm1 = vcmask 584704   ;;  %s484_s1 = inlined_call_operand.vmem [shape: bf16[16,72], index: 1, kind: input, shape index: {}]   ;;  %s485_s0 = inlined_call_operand.vmem [shape: bf16[128,16], index: 0, kind: input, shape index: {}]   ;;  %s486_s2 = inlined_call_operand.vmem [shape: bf16[128,72], index: 2, kind: output, shape index: {}]  }
   0x1   :  { %v361_v0 = vld [vmem:[%s484_s1] sm:$0xff]   ;;  %v364_v3 = vld [vmem:[%s485_s0 + $0x8] sm:$0xff]   ;;  %v366_v5 = vld [vmem:[%s485_s0 + $0x10] sm:$0xff]  }
   0x2   :  { %v362_v1 = vld [vmem:[%s485_s0] sm:$0xff]   ;;  %341 = vmatprep.subr.bf16.mxu0 %v361_v0  ;;  %359 = vmatprep.subr.bf16.mxu1 %v361_v0  ;;  %v365_v4 = vld [vmem:[%s485_s0 + $0x28] sm:$0xff]   ;;  %v367_v6 = vld [vmem:[%s485_s0 + $0x30] sm:$0xff]  }
   0x3   :  { %v363_v2 = vld [vmem:[%s485_s0 + $0x20] sm:$0xff]   ;;  %342 = vmatpush3.bf16.msra.mxu0 %v361_v0  ;;  %360 = vmatpush3.bf16.msra.mxu1 %v361_v0  ;;  %v368_v7 = vld [vmem:[%s485_s0 + $0x18] sm:$0xff]  }
   0x4   :  { %343 = vmatprep.mubr.msk.bf16.mxu0 %vm76_vm0, %v362_v1  ;;  %351 = vmatprep.mubr.msk.bf16.mxu1 %vm76_vm0, %v363_v2  ;;  %v369_v8 = vld [vmem:[%s485_s0 + $0x38] sm:$0xff]  }
   0x6   :  { %344 = vmatmul.mubr.msk.bf16.vlgmr.msra.gmra.mxu0 %vm76_vm0, %v364_v3  ;;  %352 = vmatmul.mubr.msk.bf16.vlgmr.msra.gmra.mxu1 %vm76_vm0, %v365_v4 }
   0x7   :  { %347 = vmatprep.mubr.msk.bf16.mxu0 %vm76_vm0, %v366_v5  ;;  %355 = vmatprep.mubr.msk.bf16.mxu1 %vm76_vm0, %v367_v6 }
   0xe   :  { %348 = vmatmul.mubr.msk.bf16.gmra.mxu0 %vm76_vm0, %v368_v7  ;;  %356 = vmatmul.mubr.msk.bf16.gmra.mxu1 %vm76_vm0, %v369_v8 }
  0xc6   :  { %v345_v9 = vpop.f32.mrf.mxu0  ;;  %v353_v10 = vpop.f32.mrf.mxu1 }
  0xc7   :  { %v318_v11 = vpack.c.bf16 %v345_v9, %v345_v9  ;;  %v326_v12 = vpack.c.bf16 %v353_v10, %v353_v10 }
  0xc8   :  { %v135_v13 = vpop.f32.mrf.mxu0  ;;  %v167_v14 = vpop.f32.mrf.mxu1 }
  0xc9   :  { %265 = vst.msk [vmem:[%s486_s2 + $0x8] sm:$0xf] %vm262_vm1, %v318_v11  ;;  %273 = vst.msk [vmem:[%s486_s2 + $0x28] sm:$0xf] %vm262_vm1, %v326_v12  ;;  %v316_v15 = vpack.c.bf16 %v135_v13, %v135_v13  ;;  %v324_v16 = vpack.c.bf16 %v167_v14, %v167_v14 }
  0xca   :  { %v346_v17 = vpop.f32.mrf.mxu0  ;;  %v354_v18 = vpop.f32.mrf.mxu1 }
  0xcb   :  { %263 = vst.msk [vmem:[%s486_s2] sm:$0xf] %vm262_vm1, %v316_v15  ;;  %271 = vst.msk [vmem:[%s486_s2 + $0x20] sm:$0xf] %vm262_vm1, %v324_v16  ;;  %v319_v19 = vpack.c.bf16 %v346_v17, %v346_v17  ;;  %v327_v20 = vpack.c.bf16 %v354_v18, %v354_v18 }
  0xcc   :  { %v138_v21 = vpop.f32.mrf.mxu0  ;;  %v170_v22 = vpop.f32.mrf.mxu1 }
  0xcd   :  { %266 = vst.msk [vmem:[%s486_s2 + $0xc] sm:$0xf] %vm262_vm1, %v319_v19  ;;  %274 = vst.msk [vmem:[%s486_s2 + $0x2c] sm:$0xf] %vm262_vm1, %v327_v20  ;;  %v317_v23 = vpack.c.bf16 %v138_v21, %v138_v21  ;;  %v325_v24 = vpack.c.bf16 %v170_v22, %v170_v22 }
  0xce   :  { %v349_v25 = vpop.f32.mrf.mxu0  ;;  %v357_v26 = vpop.f32.mrf.mxu1 }
  0xcf   :  { %264 = vst.msk [vmem:[%s486_s2 + $0x4] sm:$0xf] %vm262_vm1, %v317_v23  ;;  %272 = vst.msk [vmem:[%s486_s2 + $0x24] sm:$0xf] %vm262_vm1, %v325_v24  ;;  %v322_v27 = vpack.c.bf16 %v349_v25, %v349_v25  ;;  %v330_v28 = vpack.c.bf16 %v357_v26, %v357_v26 }
  0xd0   :  { %v151_v29 = vpop.f32.mrf.mxu0  ;;  %v183_v30 = vpop.f32.mrf.mxu1 }
  0xd1   :  { %269 = vst.msk [vmem:[%s486_s2 + $0x18] sm:$0xf] %vm262_vm1, %v322_v27  ;;  %277 = vst.msk [vmem:[%s486_s2 + $0x38] sm:$0xf] %vm262_vm1, %v330_v28  ;;  %v320_v31 = vpack.c.bf16 %v151_v29, %v151_v29  ;;  %v328_v32 = vpack.c.bf16 %v183_v30, %v183_v30 }
  0xd2   :  { %v350_v33 = vpop.f32.mrf.mxu0  ;;  %v358_v34 = vpop.f32.mrf.mxu1 }
  0xd3   :  { %267 = vst.msk [vmem:[%s486_s2 + $0x10] sm:$0xf] %vm262_vm1, %v320_v31  ;;  %275 = vst.msk [vmem:[%s486_s2 + $0x30] sm:$0xf] %vm262_vm1, %v328_v32  ;;  %v323_v35 = vpack.c.bf16 %v350_v33, %v350_v33  ;;  %v331_v36 = vpack.c.bf16 %v358_v34, %v358_v34 }
  0xd4   :  { %v154_v37 = vpop.f32.mrf.mxu0  ;;  %v186_v38 = vpop.f32.mrf.mxu1 }
  0xd5   :  { %270 = vst.msk [vmem:[%s486_s2 + $0x1c] sm:$0xf] %vm262_vm1, %v323_v35  ;;  %278 = vst.msk [vmem:[%s486_s2 + $0x3c] sm:$0xf] %vm262_vm1, %v331_v36  ;;  %v321_v39 = vpack.c.bf16 %v154_v37, %v154_v37  ;;  %v329_v40 = vpack.c.bf16 %v186_v38, %v186_v38 }
  0xd7   :  { %268 = vst.msk [vmem:[%s486_s2 + $0x14] sm:$0xf] %vm262_vm1, %v321_v39  ;;  %276 = vst.msk [vmem:[%s486_s2 + $0x34] sm:$0xf] %vm262_vm1, %v329_v40 }

// kernel: densenet_forward.15
= control target key start
LH: loop header
LB: loop body
LE: loop exit
PB: predicated region body
PF: predicated region fallthrough
CT: control target
= control target key end

     0   :  { %vm189_vm0 = vcmask 1043456   ;;  %v44_v0 = vlaneseq  ;;  %vm164_vm1 = vcmask 195584   ;;  %v530_v40 = vmov 0   ;;  %s776_s1 = inlined_call_operand.vmem [shape: bf16[24,16], index: 1, kind: input, shape index: {}]   ;;  %s777_s2 = inlined_call_operand.vmem [shape: bf16[1,24], index: 2, kind: input, shape index: {}]   ;;  %s778_s3 = inlined_call_operand.vmem [shape: bf16[1,24], index: 3, kind: input, shape index: {}]   ;;  %s779_s0 = inlined_call_operand.vmem [shape: bf16[128,24], index: 0, kind: input, shape index: {}]   ;;  %s780_s4 = inlined_call_operand.vmem [shape: f32[1,16], index: 4, kind: input, shape index: {}]   ;;  %s781_s5 = inlined_call_operand.vmem [shape: f32[1,16], index: 5, kind: input, shape index: {}]   ;;  %s782_s6 = inlined_call_operand.vmem [shape: bf16[128,16], index: 6, kind: output, shape index: {}]  }
   0x1   :  { %v528_v1 = vld [vmem:[%s776_s1 + $0x8] ss:$0 sps:$4 sm:$0xff]   ;;  %v529_v2 = vld [vmem:[%s776_s1] sm:$0xff]   ;;  %v27_v18 = vld [vmem:[%s779_s0 + $0xc] sm:$0xf]  ;;  %vm416_vm2 = vcmask 125952  }
   0x2   :  { %v45_v3 = vshrl.u32 %v44_v0, 7  ;;  %525 = vmatprep.subr.msk.bf16.mxu0 %vm189_vm0, %v528_v1  ;;  %526 = vmatprep.subr.msk.bf16.mxu1 %vm189_vm0, %v528_v1  ;;  %v191_v4 = vsel %vm189_vm0, %v528_v1, 0  ;;  %v40_v5 = vld [vmem:[%s777_s2] sm:$0x1]  ;;  %v25_v11 = vld [vmem:[%s779_s0 + $0x4] sm:$0xf] }
   0x3   :  { %502 = vmatpush3.bf16.msra.mxu0 %v191_v4  ;;  %523 = vmatpush3.bf16.msra.mxu1 %v191_v4  ;;  %v42_v6 = vpack.i.b16 %v40_v5, %v40_v5  ;;  %v68_v8 = vld [vmem:[%s778_s3] sm:$0x1]  ;;  %v33_v15 = vld [vmem:[%s779_s0 + $0x24] sm:$0xf]  ;;  %v26_v16 = vld [vmem:[%s779_s0 + $0x8] sm:$0xf] }
   0x4   :  { %v46_v7 = vsub.s32 0, %v45_v3  ;;  %503 = vmatprep.subr.bf16.mxu0 %v529_v2  ;;  %522 = vmatprep.subr.bf16.mxu1 %v529_v2  ;;  %v70_v9 = vpack.i.b16 %v68_v8, %v68_v8  ;;  %v24_v10 = vld [vmem:[%s779_s0] sm:$0xf]  ;;  %v34_v19 = vld [vmem:[%s779_s0 + $0x28] sm:$0xf] }
   0x5   :  { %v32_v14 = vld [vmem:[%s779_s0 + $0x20] sm:$0xf]  ;;  %v35_v20 = vld [vmem:[%s779_s0 + $0x2c] sm:$0xf]  ;;  %v28_v38 = vld [vmem:[%s779_s0 + $0x10] sm:$0xf] }
   0x6   :  { %v47_v12 = vrot.slane %v42_v6, %v46_v7  ;;  %v75_v13 = vrot.slane %v70_v9, %v46_v7  ;;  %v29_v39 = vld [vmem:[%s779_s0 + $0x14] sm:$0xf]  ;;  %v36_v45 = vld [vmem:[%s779_s0 + $0x30] sm:$0xf]  ;;  %v30_v51 = vld [vmem:[%s779_s0 + $0x18] sm:$0xf] }
   0x7   :  { %504 = vmatpush3.bf16.msra.mxu0 %v529_v2  ;;  %524 = vmatpush3.bf16.msra.mxu1 %v529_v2  ;;  %v37_v46 = vld [vmem:[%s779_s0 + $0x34] sm:$0xf]  ;;  %v31_v56 = vld [vmem:[%s779_s0 + $0x1c] sm:$0xf]  ;;  %v38_v61 = vld [vmem:[%s779_s0 + $0x38] sm:$0xf] }
   0x8   :  { %v593_v17 = vcombine.low %v47_v12, %v47_v12  ;;  %v604_v21 = vcombine.low %v75_v13, %v75_v13  ;;  %v39_v1 = vld [vmem:[%s779_s0 + $0x3c] sm:$0xf] }
   0xa   :  { %v52_v22 = vmul.bf16 %v593_v17, %v24_v10  ;;  %v53_v23 = vmul.bf16 %v593_v17, %v25_v11  ;;  %v60_v24 = vmul.bf16 %v593_v17, %v32_v14  ;;  %v61_v25 = vmul.bf16 %v593_v17, %v33_v15 }
   0xb   :  { %v54_v26 = vmul.bf16 %v593_v17, %v26_v16  ;;  %v55_v27 = vmul.bf16 %v593_v17, %v27_v18  ;;  %v62_v28 = vmul.bf16 %v593_v17, %v34_v19  ;;  %v63_v29 = vmul.bf16 %v593_v17, %v35_v20 }
   0xc   :  { %v80_v30 = vadd.bf16 %v604_v21, %v52_v22  ;;  %v81_v31 = vadd.bf16 %v604_v21, %v53_v23  ;;  %v88_v32 = vadd.bf16 %v604_v21, %v60_v24  ;;  %v89_v33 = vadd.bf16 %v604_v21, %v61_v25 }
   0xd   :  { %v82_v34 = vadd.bf16 %v604_v21, %v54_v26  ;;  %v83_v35 = vadd.bf16 %v604_v21, %v55_v27  ;;  %v90_v36 = vadd.bf16 %v604_v21, %v62_v28  ;;  %v91_v37 = vadd.bf16 %v604_v21, %v63_v29 }
   0xe   :  { %v96_v41 = vmax.bf16 %v530_v40, %v80_v30  ;;  %v97_v42 = vmax.bf16 %v530_v40, %v81_v31  ;;  %v104_v43 = vmax.bf16 %v530_v40, %v88_v32  ;;  %v105_v44 = vmax.bf16 %v530_v40, %v89_v33 }
   0xf   :  { %v98_v47 = vmax.bf16 %v530_v40, %v82_v34  ;;  %v99_v48 = vmax.bf16 %v530_v40, %v83_v35  ;;  %v106_v49 = vmax.bf16 %v530_v40, %v90_v36  ;;  %v107_v50 = vmax.bf16 %v530_v40, %v91_v37 }
  0x10   :  { %v439_v52 = vcombine.low %v96_v41, %v97_v42  ;;  %v443_v53 = vcombine.low %v104_v43, %v105_v44  ;;  %v56_v54 = vmul.bf16 %v593_v17, %v28_v38  ;;  %v57_v55 = vmul.bf16 %v593_v17, %v29_v39 }
  0x11   :  { %v440_v57 = vcombine.low %v98_v47, %v99_v48  ;;  %v444_v58 = vcombine.low %v106_v49, %v107_v50  ;;  %v64_v59 = vmul.bf16 %v593_v17, %v36_v45  ;;  %v65_v60 = vmul.bf16 %v593_v17, %v37_v46 }
  0x12   :  { %505 = vmatprep.mubr.msk.bf16.mxu0 %vm164_vm1, %v439_v52  ;;  %513 = vmatprep.mubr.msk.bf16.mxu1 %vm164_vm1, %v443_v53  ;;  %v84_v62 = vadd.bf16 %v604_v21, %v56_v54  ;;  %v85_v63 = vadd.bf16 %v604_v21, %v57_v55  ;;  %v58_v0 = vmul.bf16 %v593_v17, %v30_v51 }
  0x13   :  { %506 = vmatmul.mubr.msk.bf16.vlgmr.msra.gmra.mxu0 %vm164_vm1, %v440_v57  ;;  %514 = vmatmul.mubr.msk.bf16.vlgmr.msra.gmra.mxu1 %vm164_vm1, %v444_v58  ;;  %v92_v2 = vadd.bf16 %v604_v21, %v64_v59  ;;  %v93_v3 = vadd.bf16 %v604_v21, %v65_v60  ;;  %v59_v4 = vmul.bf16 %v593_v17, %v31_v56 }
  0x14   :  { %v100_v5 = vmax.bf16 %v530_v40, %v84_v62  ;;  %v101_v6 = vmax.bf16 %v530_v40, %v85_v63  ;;  %v86_v7 = vadd.bf16 %v604_v21, %v58_v0  ;;  %v66_v8 = vmul.bf16 %v593_v17, %v38_v61 }
  0x15   :  { %v108_v9 = vmax.bf16 %v530_v40, %v92_v2  ;;  %v109_v10 = vmax.bf16 %v530_v40, %v93_v3  ;;  %v87_v11 = vadd.bf16 %v604_v21, %v59_v4  ;;  %v67_v12 = vmul.bf16 %v593_v17, %v39_v1  ;;  %v673_v17 = vld [vmem:[%s780_s4] ss:$0 sm:$0xff] }
  0x16   :  { %v441_v13 = vcombine.low %v100_v5, %v101_v6  ;;  %v102_v14 = vmax.bf16 %v530_v40, %v86_v7  ;;  %v94_v15 = vadd.bf16 %v604_v21, %v66_v8 }
  0x17   :  { %v445_v16 = vcombine.low %v108_v9, %v109_v10  ;;  %v103_v18 = vmax.bf16 %v530_v40, %v87_v11  ;;  %v95_v19 = vadd.bf16 %v604_v21, %v67_v12  ;;  %v678_v21 = vld [vmem:[%s781_s5] ss:$0 sm:$0xff] }
  0x18   :  { %509 = vmatprep.mubr.msk.bf16.mxu0 %vm164_vm1, %v441_v13  ;;  %v110_v20 = vmax.bf16 %v530_v40, %v94_v15 }
  0x19   :  { %517 = vmatprep.mubr.msk.bf16.mxu1 %vm164_vm1, %v445_v16  ;;  %v442_v22 = vcombine.low %v102_v14, %v103_v18  ;;  %v111_v23 = vmax.bf16 %v530_v40, %v95_v19 }
  0x1b   :  { %510 = vmatmul.mubr.msk.bf16.gmra.mxu0 %vm164_vm1, %v442_v22  ;;  %v446_v24 = vcombine.low %v110_v20, %v111_v23 }
  0x1d   :  { %518 = vmatmul.mubr.msk.bf16.gmra.mxu1 %vm164_vm1, %v446_v24 }
  0xd3   :  { %v507_v25 = vpop.f32.mrf.mxu0  ;;  %v515_v26 = vpop.f32.mrf.mxu1 }
  0xd4   :  { %v299_v27 = vmul.f32 %v507_v25, %v673_v17  ;;  %v307_v28 = vmul.f32 %v515_v26, %v673_v17 }
  0xd5   :  { %v227_v29 = vpop.f32.mrf.mxu0  ;;  %v259_v30 = vpop.f32.mrf.mxu1 }
  0xd6   :  { %v322_v31 = vadd.f32 %v678_v21, %v299_v27  ;;  %v330_v32 = vadd.f32 %v678_v21, %v307_v28  ;;  %v297_v33 = vmul.f32 %v673_v17, %v227_v29  ;;  %v305_v34 = vmul.f32 %v673_v17, %v259_v30 }
  0xd7   :  { %v508_v35 = vpop.f32.mrf.mxu0  ;;  %v516_v36 = vpop.f32.mrf.mxu1 }
  0xd8   :  { %v338_v37 = vmax.f32 %v322_v31, 0.0  ;;  %v346_v38 = vmax.f32 %v330_v32, 0.0  ;;  %v320_v39 = vadd.f32 %v678_v21, %v297_v33  ;;  %v328_v40 = vadd.f32 %v678_v21, %v305_v34 }
  0xd9   :  { %v300_v41 = vmul.f32 %v508_v35, %v673_v17  ;;  %v308_v42 = vmul.f32 %v516_v36, %v673_v17  ;;  %v230_v43 = vpop.f32.mrf.mxu0  ;;  %v262_v44 = vpop.f32.mrf.mxu1 }
  0xda   :  { %v477_v45 = vpack.c.bf16 %v338_v37, %v338_v37  ;;  %v485_v46 = vpack.c.bf16 %v346_v38, %v346_v38  ;;  %v336_v47 = vmax.f32 %v320_v39, 0.0  ;;  %v344_v48 = vmax.f32 %v328_v40, 0.0 }
  0xdb   :  { %v323_v49 = vadd.f32 %v678_v21, %v300_v41  ;;  %v331_v50 = vadd.f32 %v678_v21, %v308_v42  ;;  %v298_v51 = vmul.f32 %v673_v17, %v230_v43  ;;  %v306_v52 = vmul.f32 %v673_v17, %v262_v44  ;;  %v511_v53 = vpop.f32.mrf.mxu0 }
  0xdc   :  { %419 = vst.msk [vmem:[%s782_s6 + $0x8] sm:$0xf] %vm416_vm2, %v477_v45  ;;  %427 = vst.msk [vmem:[%s782_s6 + $0x28] sm:$0xf] %vm416_vm2, %v485_v46  ;;  %v475_v54 = vpack.c.bf16 %v336_v47, %v336_v47  ;;  %v483_v55 = vpack.c.bf16 %v344_v48, %v344_v48  ;;  %v303_v56 = vmul.f32 %v511_v53, %v673_v17 }
  0xdd   :  { %v339_v57 = vmax.f32 %v323_v49, 0.0  ;;  %v347_v58 = vmax.f32 %v331_v50, 0.0  ;;  %v321_v59 = vadd.f32 %v678_v21, %v298_v51  ;;  %v329_v60 = vadd.f32 %v678_v21, %v306_v52  ;;  %v519_v61 = vpop.f32.mrf.mxu1  ;;  %v243_v62 = vpop.f32.mrf.mxu0 }
  0xde   :  { %417 = vst.msk [vmem:[%s782_s6] sm:$0xf] %vm416_vm2, %v475_v54  ;;  %425 = vst.msk [vmem:[%s782_s6 + $0x20] sm:$0xf] %vm416_vm2, %v483_v55  ;;  %v326_v63 = vadd.f32 %v678_v21, %v303_v56  ;;  %v311_v0 = vmul.f32 %v519_v61, %v673_v17  ;;  %v301_v1 = vmul.f32 %v673_v17, %v243_v62 }
  0xdf   :  { %v478_v2 = vpack.c.bf16 %v339_v57, %v339_v57  ;;  %v486_v3 = vpack.c.bf16 %v347_v58, %v347_v58  ;;  %v337_v4 = vmax.f32 %v321_v59, 0.0  ;;  %v345_v5 = vmax.f32 %v329_v60, 0.0  ;;  %v275_v6 = vpop.f32.mrf.mxu1  ;;  %v512_v7 = vpop.f32.mrf.mxu0 }
  0xe0   :  { %v342_v8 = vmax.f32 %v326_v63, 0.0  ;;  %v334_v9 = vadd.f32 %v678_v21, %v311_v0  ;;  %v324_v10 = vadd.f32 %v678_v21, %v301_v1  ;;  %v309_v11 = vmul.f32 %v673_v17, %v275_v6 }
  0xe1   :  { %420 = vst.msk [vmem:[%s782_s6 + $0xc] sm:$0xf] %vm416_vm2, %v478_v2  ;;  %428 = vst.msk [vmem:[%s782_s6 + $0x2c] sm:$0xf] %vm416_vm2, %v486_v3  ;;  %v476_v12 = vpack.c.bf16 %v337_v4, %v337_v4  ;;  %v484_v13 = vpack.c.bf16 %v345_v5, %v345_v5  ;;  %v304_v14 = vmul.f32 %v512_v7, %v673_v17  ;;  %v520_v15 = vpop.f32.mrf.mxu1  ;;  %v246_v16 = vpop.f32.mrf.mxu0 }
  0xe2   :  { %v481_v18 = vpack.c.bf16 %v342_v8, %v342_v8  ;;  %v350_v19 = vmax.f32 %v334_v9, 0.0  ;;  %v340_v20 = vmax.f32 %v324_v10, 0.0  ;;  %v332_v22 = vadd.f32 %v678_v21, %v309_v11 }
  0xe3   :  { %418 = vst.msk [vmem:[%s782_s6 + $0x4] sm:$0xf] %vm416_vm2, %v476_v12  ;;  %426 = vst.msk [vmem:[%s782_s6 + $0x24] sm:$0xf] %vm416_vm2, %v484_v13  ;;  %v327_v23 = vadd.f32 %v678_v21, %v304_v14  ;;  %v312_v24 = vmul.f32 %v520_v15, %v673_v17  ;;  %v302_v25 = vmul.f32 %v673_v17, %v246_v16  ;;  %v278_v26 = vpop.f32.mrf.mxu1 }
  0xe4   :  { %423 = vst.msk [vmem:[%s782_s6 + $0x18] sm:$0xf] %vm416_vm2, %v481_v18  ;;  %v489_v27 = vpack.c.bf16 %v350_v19, %v350_v19  ;;  %v479_v28 = vpack.c.bf16 %v340_v20, %v340_v20  ;;  %v348_v29 = vmax.f32 %v332_v22, 0.0  ;;  %v310_v30 = vmul.f32 %v673_v17, %v278_v26 }
  0xe5   :  { %v343_v31 = vmax.f32 %v327_v23, 0.0  ;;  %v335_v32 = vadd.f32 %v678_v21, %v312_v24  ;;  %v325_v33 = vadd.f32 %v678_v21, %v302_v25 }
  0xe6   :  { %431 = vst.msk [vmem:[%s782_s6 + $0x38] sm:$0xf] %vm416_vm2, %v489_v27  ;;  %421 = vst.msk [vmem:[%s782_s6 + $0x10] sm:$0xf] %vm416_vm2, %v479_v28  ;;  %v487_v34 = vpack.c.bf16 %v348_v29, %v348_v29  ;;  %v333_v35 = vadd.f32 %v678_v21, %v310_v30 }
  0xe7   :  { %v482_v36 = vpack.c.bf16 %v343_v31, %v343_v31  ;;  %v351_v17 = vmax.f32 %v335_v32, 0.0  ;;  %v341_v37 = vmax.f32 %v325_v33, 0.0 }
  0xe8   :  { %429 = vst.msk [vmem:[%s782_s6 + $0x30] sm:$0xf] %vm416_vm2, %v487_v34  ;;  %v349_v38 = vmax.f32 %v333_v35, 0.0 }
  0xe9   :  { %424 = vst.msk [vmem:[%s782_s6 + $0x1c] sm:$0xf] %vm416_vm2, %v482_v36  ;;  %v490_v39 = vpack.c.bf16 %v351_v17, %v351_v17  ;;  %v480_v40 = vpack.c.bf16 %v341_v37, %v341_v37 }
  0xea   :  { %v488_v41 = vpack.c.bf16 %v349_v38, %v349_v38 }
  0xeb   :  { %432 = vst.msk [vmem:[%s782_s6 + $0x3c] sm:$0xf] %vm416_vm2, %v490_v39  ;;  %422 = vst.msk [vmem:[%s782_s6 + $0x14] sm:$0xf] %vm416_vm2, %v480_v40 }
  0xec   :  { %430 = vst.msk [vmem:[%s782_s6 + $0x34] sm:$0xf] %vm416_vm2, %v488_v41 }

// kernel: densenet_forward.17
= control target key start
LH: loop header
LB: loop body
LE: loop exit
PB: predicated region body
PF: predicated region fallthrough
CT: control target
= control target key end

     0   :  { %v38_v0 = vlaneseq  ;;  %vm162_vm0 = vcmask 261120   ;;  %v458_v39 = vmov 0   ;;  %vm348_vm1 = vcmask 125952   ;;  %s652_s1 = inlined_call_operand.vmem [shape: bf16[32,16], index: 1, kind: input, shape index: {}]   ;;  %s653_s2 = inlined_call_operand.vmem [shape: bf16[1,32], index: 2, kind: input, shape index: {}]   ;;  %s654_s3 = inlined_call_operand.vmem [shape: bf16[1,32], index: 3, kind: input, shape index: {}]   ;;  %s655_s0 = inlined_call_operand.vmem [shape: bf16[128,32], index: 0, kind: input, shape index: {}]   ;;  %s656_s4 = inlined_call_operand.vmem [shape: bf16[128,16], index: 4, kind: output, shape index: {}]  }
   0x1   :  { %v456_v1 = vld [vmem:[%s652_s1 + $0x8] sm:$0xff]   ;;  %v457_v2 = vld [vmem:[%s652_s1] sm:$0xff]   ;;  %v22_v37 = vld [vmem:[%s655_s0 + $0x10] sm:$0xf] }
   0x2   :  { %v39_v3 = vshrl.u32 %v38_v0, 7  ;;  %431 = vmatprep.subr.bf16.mxu0 %v456_v1  ;;  %451 = vmatprep.subr.bf16.mxu1 %v456_v1  ;;  %v34_v4 = vld [vmem:[%s653_s2] sm:$0x1]  ;;  %v19_v10 = vld [vmem:[%s655_s0 + $0x4] sm:$0xf] }
   0x3   :  { %432 = vmatpush3.bf16.msra.mxu0 %v456_v1  ;;  %453 = vmatpush3.bf16.msra.mxu1 %v456_v1  ;;  %v36_v5 = vpack.i.b16 %v34_v4, %v34_v4  ;;  %v62_v7 = vld [vmem:[%s654_s3] sm:$0x1]  ;;  %v27_v14 = vld [vmem:[%s655_s0 + $0x24] sm:$0xf]  ;;  %v20_v15 = vld [vmem:[%s655_s0 + $0x8] sm:$0xf] }
   0x4   :  { %v40_v6 = vsub.s32 0, %v39_v3  ;;  %433 = vmatprep.subr.bf16.mxu0 %v457_v2  ;;  %452 = vmatprep.subr.bf16.mxu1 %v457_v2  ;;  %v64_v8 = vpack.i.b16 %v62_v7, %v62_v7  ;;  %v18_v9 = vld [vmem:[%s655_s0] sm:$0xf]  ;;  %v21_v17 = vld [vmem:[%s655_s0 + $0xc] sm:$0xf] }
   0x5   :  { %v26_v13 = vld [vmem:[%s655_s0 + $0x20] sm:$0xf]  ;;  %v28_v18 = vld [vmem:[%s655_s0 + $0x28] sm:$0xf]  ;;  %v29_v19 = vld [vmem:[%s655_s0 + $0x2c] sm:$0xf] }
   0x6   :  { %v41_v11 = vrot.slane %v36_v5, %v40_v6  ;;  %v69_v12 = vrot.slane %v64_v8, %v40_v6  ;;  %v23_v38 = vld [vmem:[%s655_s0 + $0x14] sm:$0xf]  ;;  %v30_v44 = vld [vmem:[%s655_s0 + $0x30] sm:$0xf]  ;;  %v24_v50 = vld [vmem:[%s655_s0 + $0x18] sm:$0xf] }
   0x7   :  { %434 = vmatpush3.bf16.msra.mxu0 %v457_v2  ;;  %454 = vmatpush3.bf16.msra.mxu1 %v457_v2  ;;  %v31_v45 = vld [vmem:[%s655_s0 + $0x34] sm:$0xf]  ;;  %v25_v55 = vld [vmem:[%s655_s0 + $0x1c] sm:$0xf]  ;;  %v32_v60 = vld [vmem:[%s655_s0 + $0x38] sm:$0xf] }
   0x8   :  { %v511_v16 = vcombine.low %v41_v11, %v41_v11  ;;  %v522_v20 = vcombine.low %v69_v12, %v69_v12  ;;  %v33_v0 = vld [vmem:[%s655_s0 + $0x3c] sm:$0xf] }
   0xa   :  { %v46_v21 = vmul.bf16 %v511_v16, %v18_v9  ;;  %v47_v22 = vmul.bf16 %v511_v16, %v19_v10  ;;  %v54_v23 = vmul.bf16 %v511_v16, %v26_v13  ;;  %v55_v24 = vmul.bf16 %v511_v16, %v27_v14 }
   0xb   :  { %v48_v25 = vmul.bf16 %v511_v16, %v20_v15  ;;  %v49_v26 = vmul.bf16 %v511_v16, %v21_v17  ;;  %v56_v27 = vmul.bf16 %v511_v16, %v28_v18  ;;  %v57_v28 = vmul.bf16 %v511_v16, %v29_v19 }
   0xc   :  { %v74_v29 = vadd.bf16 %v522_v20, %v46_v21  ;;  %v75_v30 = vadd.bf16 %v522_v20, %v47_v22  ;;  %v82_v31 = vadd.bf16 %v522_v20, %v54_v23  ;;  %v83_v32 = vadd.bf16 %v522_v20, %v55_v24 }
   0xd   :  { %v76_v33 = vadd.bf16 %v522_v20, %v48_v25  ;;  %v77_v34 = vadd.bf16 %v522_v20, %v49_v26  ;;  %v84_v35 = vadd.bf16 %v522_v20, %v56_v27  ;;  %v85_v36 = vadd.bf16 %v522_v20, %v57_v28 }
   0xe   :  { %v90_v40 = vmax.bf16 %v458_v39, %v74_v29  ;;  %v91_v41 = vmax.bf16 %v458_v39, %v75_v30  ;;  %v98_v42 = vmax.bf16 %v458_v39, %v82_v31  ;;  %v99_v43 = vmax.bf16 %v458_v39, %v83_v32 }
   0xf   :  { %v92_v46 = vmax.bf16 %v458_v39, %v76_v33  ;;  %v93_v47 = vmax.bf16 %v458_v39, %v77_v34  ;;  %v100_v48 = vmax.bf16 %v458_v39, %v84_v35  ;;  %v101_v49 = vmax.bf16 %v458_v39, %v85_v36 }
  0x10   :  { %v371_v51 = vcombine.low %v90_v40, %v91_v41  ;;  %v375_v52 = vcombine.low %v98_v42, %v99_v43  ;;  %v50_v53 = vmul.bf16 %v511_v16, %v22_v37  ;;  %v51_v54 = vmul.bf16 %v511_v16, %v23_v38 }
  0x11   :  { %v372_v56 = vcombine.low %v92_v46, %v93_v47  ;;  %v376_v57 = vcombine.low %v100_v48, %v101_v49  ;;  %v58_v58 = vmul.bf16 %v511_v16, %v30_v44  ;;  %v59_v59 = vmul.bf16 %v511_v16, %v31_v45 }
  0x12   :  { %435 = vmatprep.mubr.msk.bf16.mxu0 %vm162_vm0, %v371_v51  ;;  %443 = vmatprep.mubr.msk.bf16.mxu1 %vm162_vm0, %v375_v52  ;;  %v78_v61 = vadd.bf16 %v522_v20, %v50_v53  ;;  %v79_v62 = vadd.bf16 %v522_v20, %v51_v54  ;;  %v52_v63 = vmul.bf16 %v511_v16, %v24_v50 }
  0x13   :  { %436 = vmatmul.mubr.msk.bf16.vlgmr.msra.gmra.mxu0 %vm162_vm0, %v372_v56  ;;  %444 = vmatmul.mubr.msk.bf16.vlgmr.msra.gmra.mxu1 %vm162_vm0, %v376_v57  ;;  %v86_v1 = vadd.bf16 %v522_v20, %v58_v58  ;;  %v87_v2 = vadd.bf16 %v522_v20, %v59_v59  ;;  %v53_v3 = vmul.bf16 %v511_v16, %v25_v55 }
  0x14   :  { %v94_v4 = vmax.bf16 %v458_v39, %v78_v61  ;;  %v95_v5 = vmax.bf16 %v458_v39, %v79_v62  ;;  %v80_v6 = vadd.bf16 %v522_v20, %v52_v63  ;;  %v60_v7 = vmul.bf16 %v511_v16, %v32_v60 }
  0x15   :  { %v102_v8 = vmax.bf16 %v458_v39, %v86_v1  ;;  %v103_v9 = vmax.bf16 %v458_v39, %v87_v2  ;;  %v81_v10 = vadd.bf16 %v522_v20, %v53_v3  ;;  %v61_v11 = vmul.bf16 %v511_v16, %v33_v0 }
  0x16   :  { %v373_v12 = vcombine.low %v94_v4, %v95_v5  ;;  %v96_v13 = vmax.bf16 %v458_v39, %v80_v6  ;;  %v88_v14 = vadd.bf16 %v522_v20, %v60_v7 }
  0x17   :  { %v377_v15 = vcombine.low %v102_v8, %v103_v9  ;;  %v97_v17 = vmax.bf16 %v458_v39, %v81_v10  ;;  %v89_v18 = vadd.bf16 %v522_v20, %v61_v11 }
  0x18   :  { %439 = vmatprep.mubr.msk.bf16.mxu0 %vm162_vm0, %v373_v12  ;;  %v104_v19 = vmax.bf16 %v458_v39, %v88_v14 }
  0x19   :  { %447 = vmatprep.mubr.msk.bf16.mxu1 %vm162_vm0, %v377_v15  ;;  %v374_v21 = vcombine.low %v96_v13, %v97_v17  ;;  %v105_v22 = vmax.bf16 %v458_v39, %v89_v18 }
  0x1b   :  { %440 = vmatmul.mubr.msk.bf16.gmra.mxu0 %vm162_vm0, %v374_v21  ;;  %v378_v23 = vcombine.low %v104_v19, %v105_v22 }
  0x1d   :  { %448 = vmatmul.mubr.msk.bf16.gmra.mxu1 %vm162_vm0, %v378_v23 }
  0xd3   :  { %v437_v16 = vpop.f32.mrf.mxu0  ;;  %v445_v24 = vpop.f32.mrf.mxu1 }
  0xd4   :  { %v407_v25 = vpack.c.bf16 %v437_v16, %v437_v16  ;;  %v415_v26 = vpack.c.bf16 %v445_v24, %v445_v24 }
  0xd5   :  { %v221_v27 = vpop.f32.mrf.mxu0  ;;  %v253_v28 = vpop.f32.mrf.mxu1 }
  0xd6   :  { %351 = vst.msk [vmem:[%s656_s4 + $0x8] sm:$0xf] %vm348_vm1, %v407_v25  ;;  %359 = vst.msk [vmem:[%s656_s4 + $0x28] sm:$0xf] %vm348_vm1, %v415_v26  ;;  %v405_v20 = vpack.c.bf16 %v221_v27, %v221_v27  ;;  %v413_v29 = vpack.c.bf16 %v253_v28, %v253_v28 }
  0xd7   :  { %v438_v30 = vpop.f32.mrf.mxu0  ;;  %v446_v31 = vpop.f32.mrf.mxu1 }
  0xd8   :  { %349 = vst.msk [vmem:[%s656_s4] sm:$0xf] %vm348_vm1, %v405_v20  ;;  %357 = vst.msk [vmem:[%s656_s4 + $0x20] sm:$0xf] %vm348_vm1, %v413_v29  ;;  %v408_v32 = vpack.c.bf16 %v438_v30, %v438_v30  ;;  %v416_v33 = vpack.c.bf16 %v446_v31, %v446_v31 }
  0xd9   :  { %v224_v34 = vpop.f32.mrf.mxu0  ;;  %v256_v35 = vpop.f32.mrf.mxu1 }
  0xda   :  { %352 = vst.msk [vmem:[%s656_s4 + $0xc] sm:$0xf] %vm348_vm1, %v408_v32  ;;  %360 = vst.msk [vmem:[%s656_s4 + $0x2c] sm:$0xf] %vm348_vm1, %v416_v33  ;;  %v406_v36 = vpack.c.bf16 %v224_v34, %v224_v34  ;;  %v414_v37 = vpack.c.bf16 %v256_v35, %v256_v35 }
  0xdb   :  { %v441_v38 = vpop.f32.mrf.mxu0 }
  0xdc   :  { %350 = vst.msk [vmem:[%s656_s4 + $0x4] sm:$0xf] %vm348_vm1, %v406_v36  ;;  %358 = vst.msk [vmem:[%s656_s4 + $0x24] sm:$0xf] %vm348_vm1, %v414_v37  ;;  %v411_v39 = vpack.c.bf16 %v441_v38, %v441_v38 }
  0xdd   :  { %v449_v40 = vpop.f32.mrf.mxu1  ;;  %v237_v41 = vpop.f32.mrf.mxu0 }
  0xde   :  { %355 = vst.msk [vmem:[%s656_s4 + $0x18] sm:$0xf] %vm348_vm1, %v411_v39  ;;  %v419_v42 = vpack.c.bf16 %v449_v40, %v449_v40  ;;  %v409_v43 = vpack.c.bf16 %v237_v41, %v237_v41 }
  0xdf   :  { %v269_v44 = vpop.f32.mrf.mxu1  ;;  %v442_v45 = vpop.f32.mrf.mxu0 }
  0xe0   :  { %363 = vst.msk [vmem:[%s656_s4 + $0x38] sm:$0xf] %vm348_vm1, %v419_v42  ;;  %353 = vst.msk [vmem:[%s656_s4 + $0x10] sm:$0xf] %vm348_vm1, %v409_v43  ;;  %v417_v46 = vpack.c.bf16 %v269_v44, %v269_v44  ;;  %v412_v47 = vpack.c.bf16 %v442_v45, %v442_v45 }
  0xe1   :  { %v450_v48 = vpop.f32.mrf.mxu1  ;;  %v240_v49 = vpop.f32.mrf.mxu0 }
  0xe2   :  { %361 = vst.msk [vmem:[%s656_s4 + $0x30] sm:$0xf] %vm348_vm1, %v417_v46  ;;  %356 = vst.msk [vmem:[%s656_s4 + $0x1c] sm:$0xf] %vm348_vm1, %v412_v47  ;;  %v420_v50 = vpack.c.bf16 %v450_v48, %v450_v48  ;;  %v410_v51 = vpack.c.bf16 %v240_v49, %v240_v49 }
  0xe3   :  { %v272_v52 = vpop.f32.mrf.mxu1 }
  0xe4   :  { %364 = vst.msk [vmem:[%s656_s4 + $0x3c] sm:$0xf] %vm348_vm1, %v420_v50  ;;  %354 = vst.msk [vmem:[%s656_s4 + $0x14] sm:$0xf] %vm348_vm1, %v410_v51  ;;  %v418_v53 = vpack.c.bf16 %v272_v52, %v272_v52 }
  0xe6   :  { %362 = vst.msk [vmem:[%s656_s4 + $0x34] sm:$0xf] %vm348_vm1, %v418_v53 }

// kernel: densenet_forward.19
= control target key start
LH: loop header
LB: loop body
LE: loop exit
PB: predicated region body
PF: predicated region fallthrough
CT: control target
= control target key end

     0   :  { %vm34_vm0 = vcmask 130048   ;;  %vm106_vm1 = vcmask 584704   ;;  %s176_s1 = inlined_call_operand.vmem [shape: bf16[16,72], index: 1, kind: input, shape index: {}]   ;;  %s177_s0 = inlined_call_operand.vmem [shape: bf16[32,16], index: 0, kind: input, shape index: {}]   ;;  %s178_s2 = inlined_call_operand.vmem [shape: bf16[32,72], index: 2, kind: output, shape index: {}]  }
   0x1   :  { %v137_v0 = vld [vmem:[%s176_s1] sm:$0xff]   ;;  %v139_v2 = vld [vmem:[%s177_s0 + $0x8] sm:$0xff]  }
   0x2   :  { %v138_v1 = vld [vmem:[%s177_s0] sm:$0xff]   ;;  %131 = vmatprep.subr.bf16.mxu0 %v137_v0 }
   0x3   :  { %132 = vmatpush3.bf16.msra.mxu0 %v137_v0  ;;  %133 = vmatprep.mubr.msk.bf16.mxu0 %vm34_vm0, %v138_v1 }
   0x6   :  { %134 = vmatmul.mubr.msk.bf16.vlgmr.msra.gmra.mxu0 %vm34_vm0, %v139_v2 }
  0xc6   :  { %v135_v3 = vpop.f32.mrf.mxu0 }
  0xc7   :  { %v126_v4 = vpack.c.bf16 %v135_v3, %v135_v3 }
  0xc8   :  { %v75_v5 = vpop.f32.mrf.mxu0 }
  0xc9   :  { %109 = vst.msk [vmem:[%s178_s2 + $0x8] sm:$0xf] %vm106_vm1, %v126_v4  ;;  %v124_v6 = vpack.c.bf16 %v75_v5, %v75_v5 }
  0xca   :  { %v136_v7 = vpop.f32.mrf.mxu0 }
  0xcb   :  { %107 = vst.msk [vmem:[%s178_s2] sm:$0xf] %vm106_vm1, %v124_v6  ;;  %v127_v8 = vpack.c.bf16 %v136_v7, %v136_v7 }
  0xcc   :  { %v78_v9 = vpop.f32.mrf.mxu0 }
  0xcd   :  { %110 = vst.msk [vmem:[%s178_s2 + $0xc] sm:$0xf] %vm106_vm1, %v127_v8  ;;  %v125_v10 = vpack.c.bf16 %v78_v9, %v78_v9 }
  0xcf   :  { %108 = vst.msk [vmem:[%s178_s2 + $0x4] sm:$0xf] %vm106_vm1, %v125_v10 }

// kernel: densenet_forward.18
= control target key start
LH: loop header
LB: loop body
LE: loop exit
PB: predicated region body
PF: predicated region fallthrough
CT: control target
= control target key end

     0   :  { %v32_v0 = vlaneseq  ;;  %v217_v24 = vmov 0   ;;  %vm82_vm0 = vcmask 130048   ;;  %vm180_vm1 = vcmask 125952   ;;  %s292_s1 = inlined_call_operand.vmem [shape: bf16[16,16], index: 1, kind: input, shape index: {}]   ;;  %s293_s2 = inlined_call_operand.vmem [shape: bf16[1,16], index: 2, kind: input, shape index: {}]   ;;  %s294_s3 = inlined_call_operand.vmem [shape: bf16[1,16], index: 3, kind: input, shape index: {}]   ;;  %s295_s0 = inlined_call_operand.vmem [shape: bf16[32,16], index: 0, kind: input, shape index: {}]   ;;  %s296_s4 = inlined_call_operand.vmem [shape: f32[1,16], index: 4, kind: input, shape index: {}]   ;;  %s297_s5 = inlined_call_operand.vmem [shape: f32[1,16], index: 5, kind: input, shape index: {}]   ;;  %s298_s6 = inlined_call_operand.vmem [shape: bf16[32,16], index: 6, kind: output, shape index: {}]  }
   0x1   :  { %v216_v1 = vld [vmem:[%s292_s1] sm:$0xff]   ;;  %v26_v12 = vld [vmem:[%s295_s0 + $0x8] sm:$0xf]  ;;  %v27_v13 = vld [vmem:[%s295_s0 + $0xc] sm:$0xf] }
   0x2   :  { %v28_v2 = vld [vmem:[%s293_s2] sm:$0x1]  ;;  %209 = vmatprep.subr.bf16.mxu0 %v216_v1  ;;  %v33_v4 = vshrl.u32 %v32_v0, 7  ;;  %v25_v11 = vld [vmem:[%s295_s0 + $0x4] sm:$0xf] }
   0x3   :  { %v30_v3 = vpack.i.b16 %v28_v2, %v28_v2  ;;  %v44_v5 = vld [vmem:[%s294_s3] sm:$0x1]  ;;  %210 = vmatpush3.bf16.msra.mxu0 %v216_v1 }
   0x4   :  { %v46_v6 = vpack.i.b16 %v44_v5, %v44_v5  ;;  %v34_v7 = vsub.s32 0, %v33_v4  ;;  %v24_v8 = vld [vmem:[%s295_s0] sm:$0xf] }
   0x5   :  { %v196_v31 = vld [vmem:[%s296_s4] ss:$0 sm:$0xff] }
   0x6   :  { %v35_v9 = vrot.slane %v30_v3, %v34_v7  ;;  %v51_v10 = vrot.slane %v46_v6, %v34_v7  ;;  %v197_v33 = vld [vmem:[%s297_s5] ss:$0 sm:$0xff] }
   0x8   :  { %v189_v14 = vcombine.low %v35_v9, %v35_v9  ;;  %v190_v15 = vcombine.low %v51_v10, %v51_v10 }
   0xa   :  { %v40_v16 = vmul.bf16 %v189_v14, %v24_v8  ;;  %v41_v17 = vmul.bf16 %v189_v14, %v25_v11  ;;  %v42_v18 = vmul.bf16 %v189_v14, %v26_v12  ;;  %v43_v19 = vmul.bf16 %v189_v14, %v27_v13 }
   0xc   :  { %v56_v20 = vadd.bf16 %v190_v15, %v40_v16  ;;  %v57_v21 = vadd.bf16 %v190_v15, %v41_v17  ;;  %v58_v22 = vadd.bf16 %v190_v15, %v42_v18  ;;  %v59_v23 = vadd.bf16 %v190_v15, %v43_v19 }
   0xe   :  { %v60_v25 = vmax.bf16 %v217_v24, %v56_v20  ;;  %v61_v26 = vmax.bf16 %v217_v24, %v57_v21  ;;  %v62_v27 = vmax.bf16 %v217_v24, %v58_v22  ;;  %v63_v28 = vmax.bf16 %v217_v24, %v59_v23 }
  0x10   :  { %v191_v29 = vcombine.low %v60_v25, %v61_v26  ;;  %v192_v30 = vcombine.low %v62_v27, %v63_v28 }
  0x12   :  { %211 = vmatprep.mubr.msk.bf16.mxu0 %vm82_vm0, %v191_v29 }
  0x13   :  { %212 = vmatmul.mubr.msk.bf16.vlgmr.msra.gmra.mxu0 %vm82_vm0, %v192_v30 }
  0xd3   :  { %v213_v32 = vpop.f32.mrf.mxu0 }
  0xd4   :  { %v147_v34 = vmul.f32 %v213_v32, %v196_v31 }
  0xd5   :  { %v123_v35 = vpop.f32.mrf.mxu0 }
  0xd6   :  { %v158_v36 = vadd.f32 %v197_v33, %v147_v34  ;;  %v145_v37 = vmul.f32 %v196_v31, %v123_v35 }
  0xd7   :  { %v214_v38 = vpop.f32.mrf.mxu0 }
  0xd8   :  { %v162_v39 = vmax.f32 %v158_v36, 0.0  ;;  %v156_v40 = vadd.f32 %v197_v33, %v145_v37  ;;  %v148_v41 = vmul.f32 %v214_v38, %v196_v31 }
  0xd9   :  { %v126_v42 = vpop.f32.mrf.mxu0 }
  0xda   :  { %v204_v43 = vpack.c.bf16 %v162_v39, %v162_v39  ;;  %v160_v44 = vmax.f32 %v156_v40, 0.0  ;;  %v159_v45 = vadd.f32 %v197_v33, %v148_v41  ;;  %v146_v46 = vmul.f32 %v196_v31, %v126_v42 }
  0xdc   :  { %183 = vst.msk [vmem:[%s298_s6 + $0x8] sm:$0xf] %vm180_vm1, %v204_v43  ;;  %v202_v47 = vpack.c.bf16 %v160_v44, %v160_v44  ;;  %v163_v48 = vmax.f32 %v159_v45, 0.0  ;;  %v157_v49 = vadd.f32 %v197_v33, %v146_v46 }
  0xde   :  { %181 = vst.msk [vmem:[%s298_s6] sm:$0xf] %vm180_vm1, %v202_v47  ;;  %v205_v50 = vpack.c.bf16 %v163_v48, %v163_v48  ;;  %v161_v51 = vmax.f32 %v157_v49, 0.0 }
  0xe0   :  { %184 = vst.msk [vmem:[%s298_s6 + $0xc] sm:$0xf] %vm180_vm1, %v205_v50  ;;  %v203_v52 = vpack.c.bf16 %v161_v51, %v161_v51 }
  0xe2   :  { %182 = vst.msk [vmem:[%s298_s6 + $0x4] sm:$0xf] %vm180_vm1, %v203_v52 }

// kernel: densenet_forward.20
= control target key start
LH: loop header
LB: loop body
LE: loop exit
PB: predicated region body
PF: predicated region fallthrough
CT: control target
= control target key end

     0   :  { %vm93_vm0 = vcmask 1043456   ;;  %v32_v0 = vlaneseq  ;;  %v231_v26 = vmov 0   ;;  %vm86_vm1 = vcmask 195584   ;;  %s309_s1 = inlined_call_operand.vmem [shape: bf16[24,16], index: 1, kind: input, shape index: {}]   ;;  %s310_s2 = inlined_call_operand.vmem [shape: bf16[1,24], index: 2, kind: input, shape index: {}]   ;;  %s311_s3 = inlined_call_operand.vmem [shape: bf16[1,24], index: 3, kind: input, shape index: {}]   ;;  %s312_s0 = inlined_call_operand.vmem [shape: bf16[32,24], index: 0, kind: input, shape index: {}]   ;;  %s313_s4 = inlined_call_operand.vmem [shape: f32[1,16], index: 4, kind: input, shape index: {}]   ;;  %s314_s5 = inlined_call_operand.vmem [shape: f32[1,16], index: 5, kind: input, shape index: {}]   ;;  %s315_s6 = inlined_call_operand.vmem [shape: bf16[32,16], index: 6, kind: output, shape index: {}]  }
   0x1   :  { %v229_v1 = vld [vmem:[%s309_s1 + $0x8] ss:$0 sps:$4 sm:$0xff]   ;;  %v230_v2 = vld [vmem:[%s309_s1] sm:$0xff]   ;;  %v27_v15 = vld [vmem:[%s312_s0 + $0xc] sm:$0xf]  ;;  %vm188_vm2 = vcmask 125952  }
   0x2   :  { %v33_v3 = vshrl.u32 %v32_v0, 7  ;;  %227 = vmatprep.subr.msk.bf16.mxu0 %vm93_vm0, %v229_v1  ;;  %v95_v4 = vsel %vm93_vm0, %v229_v1, 0  ;;  %v28_v5 = vld [vmem:[%s310_s2] sm:$0x1]  ;;  %v25_v12 = vld [vmem:[%s312_s0 + $0x4] sm:$0xf] }
   0x3   :  { %220 = vmatpush3.bf16.msra.mxu0 %v95_v4  ;;  %v30_v6 = vpack.i.b16 %v28_v5, %v28_v5  ;;  %v44_v8 = vld [vmem:[%s311_s3] sm:$0x1]  ;;  %v26_v14 = vld [vmem:[%s312_s0 + $0x8] sm:$0xf] }
   0x4   :  { %v34_v7 = vsub.s32 0, %v33_v3  ;;  %221 = vmatprep.subr.bf16.mxu0 %v230_v2  ;;  %v46_v9 = vpack.i.b16 %v44_v8, %v44_v8  ;;  %v24_v10 = vld [vmem:[%s312_s0] sm:$0xf] }
   0x5   :  { %v205_v33 = vld [vmem:[%s313_s4] ss:$0 sm:$0xff] }
   0x6   :  { %v35_v11 = vrot.slane %v30_v6, %v34_v7  ;;  %v51_v13 = vrot.slane %v46_v9, %v34_v7  ;;  %v206_v35 = vld [vmem:[%s314_s5] ss:$0 sm:$0xff] }
   0x7   :  { %222 = vmatpush3.bf16.msra.mxu0 %v230_v2 }
   0x8   :  { %v197_v16 = vcombine.low %v35_v11, %v35_v11  ;;  %v198_v17 = vcombine.low %v51_v13, %v51_v13 }
   0xa   :  { %v40_v18 = vmul.bf16 %v197_v16, %v24_v10  ;;  %v41_v19 = vmul.bf16 %v197_v16, %v25_v12  ;;  %v42_v20 = vmul.bf16 %v197_v16, %v26_v14  ;;  %v43_v21 = vmul.bf16 %v197_v16, %v27_v15 }
   0xc   :  { %v56_v22 = vadd.bf16 %v198_v17, %v40_v18  ;;  %v57_v23 = vadd.bf16 %v198_v17, %v41_v19  ;;  %v58_v24 = vadd.bf16 %v198_v17, %v42_v20  ;;  %v59_v25 = vadd.bf16 %v198_v17, %v43_v21 }
   0xe   :  { %v60_v27 = vmax.bf16 %v231_v26, %v56_v22  ;;  %v61_v28 = vmax.bf16 %v231_v26, %v57_v23  ;;  %v62_v29 = vmax.bf16 %v231_v26, %v58_v24  ;;  %v63_v30 = vmax.bf16 %v231_v26, %v59_v25 }
  0x10   :  { %v199_v31 = vcombine.low %v60_v27, %v61_v28  ;;  %v200_v32 = vcombine.low %v62_v29, %v63_v30 }
  0x12   :  { %223 = vmatprep.mubr.msk.bf16.mxu0 %vm86_vm1, %v199_v31 }
  0x13   :  { %224 = vmatmul.mubr.msk.bf16.vlgmr.msra.gmra.mxu0 %vm86_vm1, %v200_v32 }
  0xd3   :  { %v225_v34 = vpop.f32.mrf.mxu0 }
  0xd4   :  { %v155_v36 = vmul.f32 %v225_v34, %v205_v33 }
  0xd5   :  { %v131_v37 = vpop.f32.mrf.mxu0 }
  0xd6   :  { %v166_v38 = vadd.f32 %v206_v35, %v155_v36  ;;  %v153_v39 = vmul.f32 %v205_v33, %v131_v37 }
  0xd7   :  { %v226_v40 = vpop.f32.mrf.mxu0 }
  0xd8   :  { %v170_v41 = vmax.f32 %v166_v38, 0.0  ;;  %v164_v42 = vadd.f32 %v206_v35, %v153_v39  ;;  %v156_v43 = vmul.f32 %v226_v40, %v205_v33 }
  0xd9   :  { %v134_v44 = vpop.f32.mrf.mxu0 }
  0xda   :  { %v213_v45 = vpack.c.bf16 %v170_v41, %v170_v41  ;;  %v168_v46 = vmax.f32 %v164_v42, 0.0  ;;  %v167_v47 = vadd.f32 %v206_v35, %v156_v43  ;;  %v154_v48 = vmul.f32 %v205_v33, %v134_v44 }
  0xdc   :  { %191 = vst.msk [vmem:[%s315_s6 + $0x8] sm:$0xf] %vm188_vm2, %v213_v45  ;;  %v211_v49 = vpack.c.bf16 %v168_v46, %v168_v46  ;;  %v171_v50 = vmax.f32 %v167_v47, 0.0  ;;  %v165_v51 = vadd.f32 %v206_v35, %v154_v48 }
  0xde   :  { %189 = vst.msk [vmem:[%s315_s6] sm:$0xf] %vm188_vm2, %v211_v49  ;;  %v214_v52 = vpack.c.bf16 %v171_v50, %v171_v50  ;;  %v169_v53 = vmax.f32 %v165_v51, 0.0 }
  0xe0   :  { %192 = vst.msk [vmem:[%s315_s6 + $0xc] sm:$0xf] %vm188_vm2, %v214_v52  ;;  %v212_v54 = vpack.c.bf16 %v169_v53, %v169_v53 }
  0xe2   :  { %190 = vst.msk [vmem:[%s315_s6 + $0x4] sm:$0xf] %vm188_vm2, %v212_v54 }

// kernel: densenet_forward.22
= control target key start
LH: loop header
LB: loop body
LE: loop exit
PB: predicated region body
PF: predicated region fallthrough
CT: control target
= control target key end

     0   :  { %vm64_vm0 = vcmask 257024   ;;  %s136_s0 = inlined_call_operand.vmem [shape: bf16[32,32], index: 0, kind: input, shape index: {}]   ;;  %s137_s1 = inlined_call_operand.vmem [shape: f32[1,32], index: 1, kind: input, shape index: {}]   ;;  %s138_s2 = inlined_call_operand.vmem [shape: f32[1,32], index: 2, kind: input, shape index: {}]   ;;  %s139_s3 = inlined_call_operand.vmem [shape: bf16[32,32], index: 3, kind: output, shape index: {}]  }
   0x1   :  { %v84_v0 = vld [vmem:[%s136_s0] sm:$0xff]   ;;  %v91_v4 = vld [vmem:[%s136_s0 + $0x8] sm:$0xff]  }
   0x2   :  { %v73_v1 = vld [vmem:[%s137_s1] ss:$0 sm:$0xff]  ;;  %v85_v2 = vunpack.c.l.bf16 %v84_v0  ;;  %v86_v3 = vunpack.c.h.bf16 %v84_v0  ;;  %v89_v6 = vunpack.c.l.bf16 %v91_v4  ;;  %v90_v7 = vunpack.c.h.bf16 %v91_v4 }
   0x3   :  { %v74_v5 = vld [vmem:[%s138_s2] ss:$0 sm:$0xff] }
   0x4   :  { %v29_v8 = vmul.f32 %v85_v2, %v73_v1  ;;  %v30_v9 = vmul.f32 %v86_v3, %v73_v1  ;;  %v31_v10 = vmul.f32 %v89_v6, %v73_v1  ;;  %v32_v11 = vmul.f32 %v90_v7, %v73_v1 }
   0x6   :  { %v40_v12 = vadd.f32 %v74_v5, %v29_v8  ;;  %v41_v13 = vadd.f32 %v74_v5, %v30_v9  ;;  %v42_v14 = vadd.f32 %v74_v5, %v31_v10  ;;  %v43_v15 = vadd.f32 %v74_v5, %v32_v11 }
   0x8   :  { %v44_v16 = vmax.f32 %v40_v12, 0.0  ;;  %v45_v17 = vmax.f32 %v41_v13, 0.0  ;;  %v46_v18 = vmax.f32 %v42_v14, 0.0  ;;  %v47_v19 = vmax.f32 %v43_v15, 0.0 }
   0xa   :  { %v79_v20 = vpack.c.bf16 %v44_v16, %v44_v16  ;;  %v80_v21 = vpack.c.bf16 %v45_v17, %v45_v17  ;;  %v81_v22 = vpack.c.bf16 %v46_v18, %v46_v18  ;;  %v82_v23 = vpack.c.bf16 %v47_v19, %v47_v19 }
   0xc   :  { %65 = vst.msk [vmem:[%s139_s3] sm:$0xf] %vm64_vm0, %v79_v20  ;;  %66 = vst.msk [vmem:[%s139_s3 + $0x4] sm:$0xf] %vm64_vm0, %v80_v21 }
   0xd   :  { %67 = vst.msk [vmem:[%s139_s3 + $0x8] sm:$0xf] %vm64_vm0, %v81_v22  ;;  %68 = vst.msk [vmem:[%s139_s3 + $0xc] sm:$0xf] %vm64_vm0, %v82_v23 }

// kernel: densenet_forward.23
= control target key start
LH: loop header
LB: loop body
LE: loop exit
PB: predicated region body
PF: predicated region fallthrough
CT: control target
= control target key end

     0   :  { %v153_v1 = vmov 0.0   ;;  %vm154_vm0 = vmmov 0   ;;  %s191_s0 = inlined_call_operand.vmem [shape: bf16[2,32], index: 0, kind: input, shape index: {}]   ;;  %s192_s1 = inlined_call_operand.vmem [shape: bf16[32,2], index: 1, kind: input, shape index: {}]   ;;  %s193_s2 = inlined_call_operand.vmem [shape: f32[1,2], index: 2, kind: input, shape index: {}]   ;;  %s194_s3 = inlined_call_operand.hbm [shape: f32[2,2], index: 3, kind: output, shape index: {}]  }
   0x1   :  { %v125_v0 = vld [vmem:[%s192_s1 + $0x8] sm:$0xff]   ;;  %114 = vmatprep.subr.bf16.mxu0 %v153_v1  ;;  %v126_v2 = vld [vmem:[%s192_s1] sm:$0xff]   ;;  %118 = vmatprep.mubr.msk.bf16.mxu0 %vm154_vm0, %v153_v1 }
   0x2   :  { %115 = vmatpush3.bf16.msra.mxu0 %v125_v0 }
   0x3   :  { %116 = vmatprep.subr.bf16.mxu0 %v153_v1 }
   0x4   :  { %8 = vsyncpa [#allocation3], 0  ;;  %v16_v3 = vld [vmem:[%s191_s0] sm:$0x1]  ;;  %vm40_vm1 = vcmask 261120   ;;  %s155_s1 = smov [#allocation2]  }
   0x5   :  { %v106_v4 = vld [vmem:[%s193_s2] ss:$0 sm:$0xff]  ;;  %s98_s20 = sshll.u32 %s155_s1, 4  ;;  %vm90_vm2 = vcmask 9216   ;;  %s99_s20 = int_to_ptr.vmem [resolvable:$true] %s98_s20 }
   0x6   :  { %117 = vmatpush3.bf16.msra.mxu0 %v126_v2  ;;  %s131_s0 = scalar_lea.vmem %s99_s20, 32  ;;  %p136_p1 = scmp.lt.s32.totalorder %s99_s20, %s99_s20 }
   0x7   :  { %p132_p0 = scmp.ne.s32.totalorder %s99_s20, %s131_s0  ;;  %p137_p2 = scmp.lt.s32.totalorder %s131_s0, %s131_s0 }
   0x9   :  { %119 = vmatmul.mubr.msk.bf16.vlgmr.msra.gmra.mxu0 %vm40_vm1, %v16_v3  ;;  %p138_p3 = por %p137_p2, %p136_p1 }
   0xb   :  { %p139_p4 = pnand %p138_p3, %p132_p0 }
  0xc9   :  { %v78_v5 = vpop.f32.mrf.mxu0 }
  0xca   :  { %v79_v6 = vadd.f32 %v106_v4, %v78_v5 }
  0xcb   :  { %v120_v7 = vpop.f32.mrf.mxu0 }
  0xcc   :  { %v110_v8 = vmul.f32 -1.442695, %v79_v6 }
  0xcd   :  { %v81_v9 = vpop.f32.mrf.mxu0 }
  0xce   :  { %127 = vpow2.f32 %v110_v8 }
  0xcf   :  { %v121_v10 = vpop.f32.mrf.mxu0 }
  0xdb   :  { %v128_v11 = vpop.eup %127 }
  0xdc   :  { %v87_v12 = vadd.f32 1.0, %v128_v11 }
  0xde   :  { %129 = vrcp.f32 %v87_v12 }
  0xeb   :  { %v130_v13 = vpop.eup %129 }
  0xec   :  { %91 = vst.msk [vmem:[#allocation2] sm:$0x3] %vm90_vm2, %v130_v13 }
  0xed   :  { %142 = shalt.err (!%p139_p4)
}
  0xee   :  { %101 = dma.vmem_to_hbm [thread:$0]  %s99_s20, 32, %s194_s3, [#allocation3]  }
  0xef   :  { %151 = dma.done.wait [#allocation3], 32  }
  0xf0   :  { %152 = vsyncadd [#allocation3], 4294967264 }
  0xf1   :  { %105 = vsyncpa [#allocation3], 1 }

</bundles_post_ra>
